<compile_context>
chip_gen: v7x
topology: tpu7x:2x2x1
jax: 0.10.0
libtpu: 0.0.40
codegen_flags: <defaults>
</compile_context>

<pallas_src>
import math
import functools

import jax
import jax.numpy as jnp
import numpy as np
from jax.experimental import pallas as pl
from jax.experimental.pallas import tpu as pltpu


def _layer_norm(x, gamma, beta, eps):
    # torch.nn.LayerNorm: biased variance over last dim, eps inside the sqrt.
    mean = jnp.mean(x, axis=-1, keepdims=True)
    xc = x - mean
    var = jnp.mean(xc * xc, axis=-1, keepdims=True)
    inv = jax.lax.rsqrt(var + eps)
    return xc * inv * gamma + beta


def _encoder_block_kernel(x_ref, wqkv_ref, wo_ref, bo_ref,
                          w1_ref, b1_ref, w2_ref, b2_ref,
                          g1_ref, be1_ref, g2_ref, be2_ref,
                          out_ref, *, num_heads, dim_k, seq_len, batch_block, eps):
    f32 = jnp.float32
    bf16 = jnp.bfloat16
    D = num_heads * dim_k
    S = seq_len
    bb = batch_block
    rows = bb * S

    x2d = x_ref[...].astype(f32)                                     # (rows, D)

    # ---- Multi-head self-attention -------------------------------------------------
    # Single fused QKV projection: one (rows, D) @ (D, 3D) MXU matmul (bf16 in, f32 acc).
    qkv = jnp.dot(x2d.astype(bf16), wqkv_ref[...],
                  preferred_element_type=f32)                        # (rows, 3D)
    qkv3 = qkv.reshape(bb, S, 3 * D)                                 # split rows -> (bb, S, 3D)

    wo = wo_ref[...]                                                 # (D, D) bf16, hoisted
    inv_sqrt_dk = 1.0 / math.sqrt(dim_k)

    acc = jnp.zeros((rows, D), f32)
    for h in range(num_heads):                                       # static loop over heads
        q = qkv3[:, :, h * dim_k:(h + 1) * dim_k].astype(bf16)               # (bb, S, dk)
        k = qkv3[:, :, D + h * dim_k:D + (h + 1) * dim_k].astype(bf16)       # (bb, S, dk)
        v = qkv3[:, :, 2 * D + h * dim_k:2 * D + (h + 1) * dim_k].astype(bf16)

        # contract on dk directly (no explicit k.T materialization)
        s = jnp.einsum("bqd,bkd->bqk", q, k, preferred_element_type=f32) * inv_sqrt_dk
        s = s - jnp.max(s, axis=-1, keepdims=True)
        e = jnp.exp(s)
        p = e * pl.reciprocal(jnp.sum(e, axis=-1, keepdims=True), approx=True)
        o = jnp.einsum("bqk,bkd->bqd", p.astype(bf16), v,
                       preferred_element_type=f32)                   # (bb, S, dk)

        # accumulate the W_out projection per head: no concat / relayout of head outputs
        acc = acc + jnp.dot(o.reshape(rows, dim_k).astype(bf16),
                            wo[h * dim_k:(h + 1) * dim_k, :],
                            preferred_element_type=f32)              # (rows, D)

    attn = acc + bo_ref[...]
    # dropout == identity at inference; residual + LayerNorm1 (f32)
    x1 = _layer_norm(attn + x2d, g1_ref[...], be1_ref[...], eps)     # (rows, D)

    # ---- Feed-forward ----------------------------------------------------------------
    h1 = jnp.dot(x1.astype(bf16), w1_ref[...], preferred_element_type=f32) + b1_ref[...]
    h1 = jnp.maximum(h1, 0.0)
    ff = jnp.dot(h1.astype(bf16), w2_ref[...], preferred_element_type=f32) + b2_ref[...]

    # dropout == identity at inference; residual + LayerNorm2 (f32)
    x2 = _layer_norm(ff + x1, g2_ref[...], be2_ref[...], eps)
    out_ref[...] = x2.astype(out_ref.dtype)                          # lane-dense (rows, D) slab


def _pick_batch_block(batch, seq, max_rows=512, target_rows=128):
    """Largest/smallest divisor of `batch` whose row tile reaches ~target_rows (<= max_rows)."""
    best = 1
    for bb in range(1, batch + 1):
        if batch % bb == 0 and bb * seq <= max_rows:
            best = bb
            if bb * seq >= target_rows:
                break
    return best


def encoder_block_forward(x, params, *, eps=1e-5):
    """x: (batch, seq, model_dim) f32. params: dict of weights (see __main__)."""
    B, S, D = x.shape
    H, _, dk = params["wq_heads"].shape
    E = params["w1"].shape[1]
    assert H * dk == D

    bf16 = jnp.bfloat16

    # Concatenate per-head projection weights head-major along the output dim, then fuse
    # Q/K/V into a single (D, 3D) weight so the kernel does one projection matmul per tile.
    def cat_heads(w):  # (H, D, dk) -> (D, H*dk)
        return jnp.transpose(w, (1, 0, 2)).reshape(D, H * dk)

    wqkv = jnp.concatenate([cat_heads(params["wq_heads"]),
                            cat_heads(params["wk_heads"]),
                            cat_heads(params["wv_heads"])], axis=1).astype(bf16)  # (D, 3D)
    wo = params["wo"].astype(bf16)
    w1 = params["w1"].astype(bf16)
    w2 = params["w2"].astype(bf16)
    bo, b1, b2 = params["bo"], params["b1"], params["b2"]
    g1, be1, g2, be2 = params["g1"], params["be1"], params["g2"], params["be2"]

    # Fold bb batch elements into each grid step -> (bb*S, D) row tiles on the MXU.
    bb = _pick_batch_block(B, S)
    rows = bb * S
    x2d = x.reshape(B * S, D)

    operands = (x2d, wqkv, wo, bo, w1, b1, w2, b2, g1, be1, g2, be2)

    def const(i):
        return (0, 0)

    in_specs = [
        pl.BlockSpec((rows, D), lambda i: (i, 0)),   # x: bb batch elements folded per step
        pl.BlockSpec((D, 3 * D), const),             # fused Wqkv (bf16)
        pl.BlockSpec((D, D), const),                 # W_out (bf16)
        pl.BlockSpec((1, D), const),                 # b_out
        pl.BlockSpec((D, E), const),                 # FF layer1 weight (bf16)
        pl.BlockSpec((1, E), const),                 # FF layer1 bias
        pl.BlockSpec((E, D), const),                 # FF layer2 weight (bf16)
        pl.BlockSpec((1, D), const),                 # FF layer2 bias
        pl.BlockSpec((1, D), const),                 # LN1 gamma
        pl.BlockSpec((1, D), const),                 # LN1 beta
        pl.BlockSpec((1, D), const),                 # LN2 gamma
        pl.BlockSpec((1, D), const),                 # LN2 beta
    ]

    # VMEM budget from actual block sizes; cap at the chip's physical VMEM (with headroom).
    weight_bytes = sum(int(a.size) * a.dtype.itemsize for a in operands[1:])
    act_block_bytes = rows * D * 4                                  # one x / out block
    interm_bytes = rows * (3 * D + 2 * E + 8 * D) * 4 + bb * H * S * S * 4
    need = 2 * weight_bytes + 4 * act_block_bytes + interm_bytes + (8 << 20)
    try:
        cap = int(pltpu.get_tpu_info().vmem_capacity_bytes)
    except Exception:  # fall back to the smallest current-gen capacity (v7x per-TC)
        cap = 64 << 20
    vmem_limit = int(min(max(need, 32 << 20), int(cap * 0.9)))

    # Advisory cost estimate so XLA schedules surrounding ops sensibly.
    flops = 2 * B * S * D * (3 * D + D + 2 * E) + 4 * B * H * S * S * dk
    cost = pl.CostEstimate(
        flops=int(flops),
        transcendentals=int(B * H * S * S + 4 * B * S),
        bytes_accessed=int(weight_bytes + 2 * B * S * D * 4),
    )

    kernel = functools.partial(_encoder_block_kernel, num_heads=H, dim_k=dk,
                               seq_len=S, batch_block=bb, eps=eps)

    out2d = pl.pallas_call(
        kernel,
        out_shape=jax.ShapeDtypeStruct((B * S, D), x.dtype),
        grid_spec=pltpu.PrefetchScalarGridSpec(
            num_scalar_prefetch=0,
            grid=(B // bb,),
            in_specs=in_specs,
            out_specs=pl.BlockSpec((rows, D), lambda i: (i, 0)),
        ),
        compiler_params=pltpu.CompilerParams(
            dimension_semantics=("parallel",),
            vmem_limit_bytes=vmem_limit,
        ),
        cost_estimate=cost,
    )(*operands)
    return out2d.reshape(B, S, D)


def encoder_block_ref(x, params, *, eps=1e-5):
    """Pure-JAX reference mirroring the PyTorch EncoderBlock forward (eval mode, f32)."""
    H, D, dk = params["wq_heads"].shape
    heads = []
    for h in range(H):
        q = x @ params["wq_heads"][h]
        k = x @ params["wk_heads"][h]
        v = x @ params["wv_heads"][h]
        s = jnp.einsum("bqd,bkd->bqk", q, k) / math.sqrt(dk)
        a = jax.nn.softmax(s, axis=-1)
        heads.append(jnp.einsum("bqk,bkd->bqd", a, v))
    attn = jnp.concatenate(heads, axis=-1) @ params["wo"] + params["bo"]
    x1 = _layer_norm(attn + x, params["g1"], params["be1"], eps)
    ff = jnp.maximum(x1 @ params["w1"] + params["b1"], 0.0) @ params["w2"] + params["b2"]
    return _layer_norm(ff + x1, params["g2"], params["be2"], eps)


if __name__ == "__main__":
    batch, seq = 2, 16
    model_dim, num_heads, expansion_dim = 64, 4, 128
    dim_k = model_dim // num_heads

    key = jax.random.PRNGKey(0)
    ks = jax.random.split(key, 16)

    def rnd(k, shape, scale=0.1):
        return (scale * jax.random.normal(k, shape)).astype(jnp.float32)

    params = {
        "wq_heads": rnd(ks[0], (num_heads, model_dim, dim_k)),
        "wk_heads": rnd(ks[1], (num_heads, model_dim, dim_k)),
        "wv_heads": rnd(ks[2], (num_heads, model_dim, dim_k)),
        "wo": rnd(ks[3], (model_dim, model_dim)),
        "bo": rnd(ks[4], (1, model_dim)),
        "w1": rnd(ks[5], (model_dim, expansion_dim)),
        "b1": rnd(ks[6], (1, expansion_dim)),
        "w2": rnd(ks[7], (expansion_dim, model_dim)),
        "b2": rnd(ks[8], (1, model_dim)),
        "g1": (1.0 + 0.1 * jax.random.normal(ks[9], (1, model_dim))).astype(jnp.float32),
        "be1": rnd(ks[10], (1, model_dim)),
        "g2": (1.0 + 0.1 * jax.random.normal(ks[11], (1, model_dim))).astype(jnp.float32),
        "be2": rnd(ks[12], (1, model_dim)),
    }
    x = jax.random.normal(ks[13], (batch, seq, model_dim), dtype=jnp.float32)

    out = encoder_block_forward(x, params)
    out = jax.block_until_ready(out)

    ref = encoder_block_ref(x, params)
    # bf16 MXU inputs (f32 accumulation) + approx reciprocal in softmax -> looser tolerance.
    np.testing.assert_allclose(np.asarray(out), np.asarray(ref), rtol=2e-2, atol=2e-2)

    print("KERNEL_OK")
</pallas_src>

<mosaic_0001>
module attributes {stable_mosaic.version = 11 : i64} {
  func.func @_encoder_block_kernel(%arg0: i32, %arg1: memref<32x64xf32, #tpu.memory_space<vmem>>, %arg2: memref<64x192xbf16, #tpu.memory_space<vmem>>, %arg3: memref<64x64xbf16, #tpu.memory_space<vmem>>, %arg4: memref<1x64xf32, #tpu.memory_space<vmem>>, %arg5: memref<64x128xbf16, #tpu.memory_space<vmem>>, %arg6: memref<1x128xf32, #tpu.memory_space<vmem>>, %arg7: memref<128x64xbf16, #tpu.memory_space<vmem>>, %arg8: memref<1x64xf32, #tpu.memory_space<vmem>>, %arg9: memref<1x64xf32, #tpu.memory_space<vmem>>, %arg10: memref<1x64xf32, #tpu.memory_space<vmem>>, %arg11: memref<1x64xf32, #tpu.memory_space<vmem>>, %arg12: memref<1x64xf32, #tpu.memory_space<vmem>>, %arg13: memref<32x64xf32, #tpu.memory_space<vmem>>) attributes {dimension_semantics = [#tpu.dimension_semantics<parallel>], iteration_bounds = array<i64: 1>, scalar_prefetch = 0 : i64, scratch_operands = 0 : i64, tpu.core_type = #tpu.core_type<tc>, window_params = [{transform_indices = @transform_0, window_bounds = array<i64: 32, 64>}, {pipeline_mode = #tpu.pipeline_mode<synchronous>, transform_indices = @transform_1, window_bounds = array<i64: 64, 192>}, {pipeline_mode = #tpu.pipeline_mode<synchronous>, transform_indices = @transform_2, window_bounds = array<i64: 64, 64>}, {pipeline_mode = #tpu.pipeline_mode<synchronous>, transform_indices = @transform_3, window_bounds = array<i64: 1, 64>}, {pipeline_mode = #tpu.pipeline_mode<synchronous>, transform_indices = @transform_4, window_bounds = array<i64: 64, 128>}, {pipeline_mode = #tpu.pipeline_mode<synchronous>, transform_indices = @transform_5, window_bounds = array<i64: 1, 128>}, {pipeline_mode = #tpu.pipeline_mode<synchronous>, transform_indices = @transform_6, window_bounds = array<i64: 128, 64>}, {pipeline_mode = #tpu.pipeline_mode<synchronous>, transform_indices = @transform_7, window_bounds = array<i64: 1, 64>}, {pipeline_mode = #tpu.pipeline_mode<synchronous>, transform_indices = @transform_8, window_bounds = array<i64: 1, 64>}, {pipeline_mode = #tpu.pipeline_mode<synchronous>, transform_indices = @transform_9, window_bounds = array<i64: 1, 64>}, {pipeline_mode = #tpu.pipeline_mode<synchronous>, transform_indices = @transform_10, window_bounds = array<i64: 1, 64>}, {pipeline_mode = #tpu.pipeline_mode<synchronous>, transform_indices = @transform_11, window_bounds = array<i64: 1, 64>}, {transform_indices = @transform_12, window_bounds = array<i64: 32, 64>}]} {
    %c0 = arith.constant 0 : index
    %c0_0 = arith.constant 0 : index
    %0 = vector.load %arg1[%c0, %c0_0] : memref<32x64xf32, #tpu.memory_space<vmem>>, vector<32x64xf32>
    %1 = arith.truncf %0 : vector<32x64xf32> to vector<32x64xbf16>
    %c0_1 = arith.constant 0 : index
    %c0_2 = arith.constant 0 : index
    %2 = vector.load %arg2[%c0_1, %c0_2] : memref<64x192xbf16, #tpu.memory_space<vmem>>, vector<64x192xbf16>
    %cst = arith.constant dense<0.000000e+00> : vector<32x192xf32>
    %3 = tpu.matmul %1, %2, %cst {dimension_numbers = #tpu.dot_dimension_numbers<[1], [0], [0], [1], [0, 0, 1, 1], [], []>} : vector<32x64xbf16>, vector<64x192xbf16>, vector<32x192xf32> -> vector<32x192xf32>
    %4 = vector.shape_cast %3 : vector<32x192xf32> to vector<2x16x192xf32>
    %c0_3 = arith.constant 0 : index
    %c0_4 = arith.constant 0 : index
    %5 = vector.load %arg3[%c0_3, %c0_4] : memref<64x64xbf16, #tpu.memory_space<vmem>>, vector<64x64xbf16>
    %cst_5 = arith.constant 0.000000e+00 : f32
    %6 = vector.broadcast %cst_5 : f32 to vector<32x64xf32>
    %7 = vector.extract_strided_slice %4 {offsets = [0, 0, 0], sizes = [2, 16, 16], strides = [1, 1, 1]} : vector<2x16x192xf32> to vector<2x16x16xf32>
    %8 = arith.truncf %7 : vector<2x16x16xf32> to vector<2x16x16xbf16>
    %9 = vector.extract_strided_slice %4 {offsets = [0, 0, 64], sizes = [2, 16, 16], strides = [1, 1, 1]} : vector<2x16x192xf32> to vector<2x16x16xf32>
    %10 = arith.truncf %9 : vector<2x16x16xf32> to vector<2x16x16xbf16>
    %11 = vector.extract_strided_slice %4 {offsets = [0, 0, 128], sizes = [2, 16, 16], strides = [1, 1, 1]} : vector<2x16x192xf32> to vector<2x16x16xf32>
    %12 = arith.truncf %11 : vector<2x16x16xf32> to vector<2x16x16xbf16>
    "tpu.trace_start"() <{level = 10 : i32, message = "bqd,bkd->bqk"}> : () -> ()
    %cst_6 = arith.constant dense<0.000000e+00> : vector<2x16x16xf32>
    %13 = tpu.matmul %8, %10, %cst_6 {dimension_numbers = #tpu.dot_dimension_numbers<[2], [2], [1], [1], [0, 0, 0, 1, 1, 1], [0], [0]>} : vector<2x16x16xbf16>, vector<2x16x16xbf16>, vector<2x16x16xf32> -> vector<2x16x16xf32>
    "tpu.trace_stop"() : () -> ()
    %cst_7 = arith.constant 2.500000e-01 : f32
    %14 = vector.broadcast %cst_7 : f32 to vector<2x16x16xf32>
    %15 = arith.mulf %13, %14 : vector<2x16x16xf32>
    %cst_8 = arith.constant dense<0xFF800000> : vector<2x16xf32>
    %16 = vector.multi_reduction <maximumf>, %15, %cst_8 [2] : vector<2x16x16xf32> to vector<2x16xf32>
    %17 = vector.shape_cast %16 : vector<2x16xf32> to vector<2x16x1xf32>
    %18 = vector.broadcast %17 : vector<2x16x1xf32> to vector<2x16x16xf32>
    %19 = arith.subf %15, %18 : vector<2x16x16xf32>
    %20 = math.exp %19 : vector<2x16x16xf32>
    %cst_9 = arith.constant dense<0.000000e+00> : vector<2x16xf32>
    %21 = vector.multi_reduction <add>, %20, %cst_9 [2] : vector<2x16x16xf32> to vector<2x16xf32>
    %22 = vector.shape_cast %21 : vector<2x16xf32> to vector<2x16x1xf32>
    %23 = tpu.reciprocal %22 {approx = true} : vector<2x16x1xf32> -> vector<2x16x1xf32>
    %24 = vector.broadcast %23 : vector<2x16x1xf32> to vector<2x16x16xf32>
    %25 = arith.mulf %20, %24 : vector<2x16x16xf32>
    %26 = arith.truncf %25 : vector<2x16x16xf32> to vector<2x16x16xbf16>
    "tpu.trace_start"() <{level = 10 : i32, message = "bqk,bkd->bqd"}> : () -> ()
    %cst_10 = arith.constant dense<0.000000e+00> : vector<2x16x16xf32>
    %27 = tpu.matmul %26, %12, %cst_10 {dimension_numbers = #tpu.dot_dimension_numbers<[2], [1], [1], [2], [0, 0, 0, 1, 1, 2], [0], [0]>} : vector<2x16x16xbf16>, vector<2x16x16xbf16>, vector<2x16x16xf32> -> vector<2x16x16xf32>
    "tpu.trace_stop"() : () -> ()
    %28 = vector.shape_cast %27 : vector<2x16x16xf32> to vector<32x16xf32>
    %29 = arith.truncf %28 : vector<32x16xf32> to vector<32x16xbf16>
    %30 = vector.extract_strided_slice %5 {offsets = [0, 0], sizes = [16, 64], strides = [1, 1]} : vector<64x64xbf16> to vector<16x64xbf16>
    %cst_11 = arith.constant dense<0.000000e+00> : vector<32x64xf32>
    %31 = tpu.matmul %29, %30, %cst_11 {dimension_numbers = #tpu.dot_dimension_numbers<[1], [0], [0], [1], [0, 0, 1, 1], [], []>} : vector<32x16xbf16>, vector<16x64xbf16>, vector<32x64xf32> -> vector<32x64xf32>
    %32 = arith.addf %6, %31 : vector<32x64xf32>
    %33 = vector.extract_strided_slice %4 {offsets = [0, 0, 16], sizes = [2, 16, 16], strides = [1, 1, 1]} : vector<2x16x192xf32> to vector<2x16x16xf32>
    %34 = arith.truncf %33 : vector<2x16x16xf32> to vector<2x16x16xbf16>
    %35 = vector.extract_strided_slice %4 {offsets = [0, 0, 80], sizes = [2, 16, 16], strides = [1, 1, 1]} : vector<2x16x192xf32> to vector<2x16x16xf32>
    %36 = arith.truncf %35 : vector<2x16x16xf32> to vector<2x16x16xbf16>
    %37 = vector.extract_strided_slice %4 {offsets = [0, 0, 144], sizes = [2, 16, 16], strides = [1, 1, 1]} : vector<2x16x192xf32> to vector<2x16x16xf32>
    %38 = arith.truncf %37 : vector<2x16x16xf32> to vector<2x16x16xbf16>
    "tpu.trace_start"() <{level = 10 : i32, message = "bqd,bkd->bqk"}> : () -> ()
    %cst_12 = arith.constant dense<0.000000e+00> : vector<2x16x16xf32>
    %39 = tpu.matmul %34, %36, %cst_12 {dimension_numbers = #tpu.dot_dimension_numbers<[2], [2], [1], [1], [0, 0, 0, 1, 1, 1], [0], [0]>} : vector<2x16x16xbf16>, vector<2x16x16xbf16>, vector<2x16x16xf32> -> vector<2x16x16xf32>
    "tpu.trace_stop"() : () -> ()
    %cst_13 = arith.constant 2.500000e-01 : f32
    %40 = vector.broadcast %cst_13 : f32 to vector<2x16x16xf32>
    %41 = arith.mulf %39, %40 : vector<2x16x16xf32>
    %cst_14 = arith.constant dense<0xFF800000> : vector<2x16xf32>
    %42 = vector.multi_reduction <maximumf>, %41, %cst_14 [2] : vector<2x16x16xf32> to vector<2x16xf32>
    %43 = vector.shape_cast %42 : vector<2x16xf32> to vector<2x16x1xf32>
    %44 = vector.broadcast %43 : vector<2x16x1xf32> to vector<2x16x16xf32>
    %45 = arith.subf %41, %44 : vector<2x16x16xf32>
    %46 = math.exp %45 : vector<2x16x16xf32>
    %cst_15 = arith.constant dense<0.000000e+00> : vector<2x16xf32>
    %47 = vector.multi_reduction <add>, %46, %cst_15 [2] : vector<2x16x16xf32> to vector<2x16xf32>
    %48 = vector.shape_cast %47 : vector<2x16xf32> to vector<2x16x1xf32>
    %49 = tpu.reciprocal %48 {approx = true} : vector<2x16x1xf32> -> vector<2x16x1xf32>
    %50 = vector.broadcast %49 : vector<2x16x1xf32> to vector<2x16x16xf32>
    %51 = arith.mulf %46, %50 : vector<2x16x16xf32>
    %52 = arith.truncf %51 : vector<2x16x16xf32> to vector<2x16x16xbf16>
    "tpu.trace_start"() <{level = 10 : i32, message = "bqk,bkd->bqd"}> : () -> ()
    %cst_16 = arith.constant dense<0.000000e+00> : vector<2x16x16xf32>
    %53 = tpu.matmul %52, %38, %cst_16 {dimension_numbers = #tpu.dot_dimension_numbers<[2], [1], [1], [2], [0, 0, 0, 1, 1, 2], [0], [0]>} : vector<2x16x16xbf16>, vector<2x16x16xbf16>, vector<2x16x16xf32> -> vector<2x16x16xf32>
    "tpu.trace_stop"() : () -> ()
    %54 = vector.shape_cast %53 : vector<2x16x16xf32> to vector<32x16xf32>
    %55 = arith.truncf %54 : vector<32x16xf32> to vector<32x16xbf16>
    %56 = vector.extract_strided_slice %5 {offsets = [16, 0], sizes = [16, 64], strides = [1, 1]} : vector<64x64xbf16> to vector<16x64xbf16>
    %cst_17 = arith.constant dense<0.000000e+00> : vector<32x64xf32>
    %57 = tpu.matmul %55, %56, %cst_17 {dimension_numbers = #tpu.dot_dimension_numbers<[1], [0], [0], [1], [0, 0, 1, 1], [], []>} : vector<32x16xbf16>, vector<16x64xbf16>, vector<32x64xf32> -> vector<32x64xf32>
    %58 = arith.addf %32, %57 : vector<32x64xf32>
    %59 = vector.extract_strided_slice %4 {offsets = [0, 0, 32], sizes = [2, 16, 16], strides = [1, 1, 1]} : vector<2x16x192xf32> to vector<2x16x16xf32>
    %60 = arith.truncf %59 : vector<2x16x16xf32> to vector<2x16x16xbf16>
    %61 = vector.extract_strided_slice %4 {offsets = [0, 0, 96], sizes = [2, 16, 16], strides = [1, 1, 1]} : vector<2x16x192xf32> to vector<2x16x16xf32>
    %62 = arith.truncf %61 : vector<2x16x16xf32> to vector<2x16x16xbf16>
    %63 = vector.extract_strided_slice %4 {offsets = [0, 0, 160], sizes = [2, 16, 16], strides = [1, 1, 1]} : vector<2x16x192xf32> to vector<2x16x16xf32>
    %64 = arith.truncf %63 : vector<2x16x16xf32> to vector<2x16x16xbf16>
    "tpu.trace_start"() <{level = 10 : i32, message = "bqd,bkd->bqk"}> : () -> ()
    %cst_18 = arith.constant dense<0.000000e+00> : vector<2x16x16xf32>
    %65 = tpu.matmul %60, %62, %cst_18 {dimension_numbers = #tpu.dot_dimension_numbers<[2], [2], [1], [1], [0, 0, 0, 1, 1, 1], [0], [0]>} : vector<2x16x16xbf16>, vector<2x16x16xbf16>, vector<2x16x16xf32> -> vector<2x16x16xf32>
    "tpu.trace_stop"() : () -> ()
    %cst_19 = arith.constant 2.500000e-01 : f32
    %66 = vector.broadcast %cst_19 : f32 to vector<2x16x16xf32>
    %67 = arith.mulf %65, %66 : vector<2x16x16xf32>
    %cst_20 = arith.constant dense<0xFF800000> : vector<2x16xf32>
    %68 = vector.multi_reduction <maximumf>, %67, %cst_20 [2] : vector<2x16x16xf32> to vector<2x16xf32>
    %69 = vector.shape_cast %68 : vector<2x16xf32> to vector<2x16x1xf32>
    %70 = vector.broadcast %69 : vector<2x16x1xf32> to vector<2x16x16xf32>
    %71 = arith.subf %67, %70 : vector<2x16x16xf32>
    %72 = math.exp %71 : vector<2x16x16xf32>
    %cst_21 = arith.constant dense<0.000000e+00> : vector<2x16xf32>
    %73 = vector.multi_reduction <add>, %72, %cst_21 [2] : vector<2x16x16xf32> to vector<2x16xf32>
    %74 = vector.shape_cast %73 : vector<2x16xf32> to vector<2x16x1xf32>
    %75 = tpu.reciprocal %74 {approx = true} : vector<2x16x1xf32> -> vector<2x16x1xf32>
    %76 = vector.broadcast %75 : vector<2x16x1xf32> to vector<2x16x16xf32>
    %77 = arith.mulf %72, %76 : vector<2x16x16xf32>
    %78 = arith.truncf %77 : vector<2x16x16xf32> to vector<2x16x16xbf16>
    "tpu.trace_start"() <{level = 10 : i32, message = "bqk,bkd->bqd"}> : () -> ()
    %cst_22 = arith.constant dense<0.000000e+00> : vector<2x16x16xf32>
    %79 = tpu.matmul %78, %64, %cst_22 {dimension_numbers = #tpu.dot_dimension_numbers<[2], [1], [1], [2], [0, 0, 0, 1, 1, 2], [0], [0]>} : vector<2x16x16xbf16>, vector<2x16x16xbf16>, vector<2x16x16xf32> -> vector<2x16x16xf32>
    "tpu.trace_stop"() : () -> ()
    %80 = vector.shape_cast %79 : vector<2x16x16xf32> to vector<32x16xf32>
    %81 = arith.truncf %80 : vector<32x16xf32> to vector<32x16xbf16>
    %82 = vector.extract_strided_slice %5 {offsets = [32, 0], sizes = [16, 64], strides = [1, 1]} : vector<64x64xbf16> to vector<16x64xbf16>
    %cst_23 = arith.constant dense<0.000000e+00> : vector<32x64xf32>
    %83 = tpu.matmul %81, %82, %cst_23 {dimension_numbers = #tpu.dot_dimension_numbers<[1], [0], [0], [1], [0, 0, 1, 1], [], []>} : vector<32x16xbf16>, vector<16x64xbf16>, vector<32x64xf32> -> vector<32x64xf32>
    %84 = arith.addf %58, %83 : vector<32x64xf32>
    %85 = vector.extract_strided_slice %4 {offsets = [0, 0, 48], sizes = [2, 16, 16], strides = [1, 1, 1]} : vector<2x16x192xf32> to vector<2x16x16xf32>
    %86 = arith.truncf %85 : vector<2x16x16xf32> to vector<2x16x16xbf16>
    %87 = vector.extract_strided_slice %4 {offsets = [0, 0, 112], sizes = [2, 16, 16], strides = [1, 1, 1]} : vector<2x16x192xf32> to vector<2x16x16xf32>
    %88 = arith.truncf %87 : vector<2x16x16xf32> to vector<2x16x16xbf16>
    %89 = vector.extract_strided_slice %4 {offsets = [0, 0, 176], sizes = [2, 16, 16], strides = [1, 1, 1]} : vector<2x16x192xf32> to vector<2x16x16xf32>
    %90 = arith.truncf %89 : vector<2x16x16xf32> to vector<2x16x16xbf16>
    "tpu.trace_start"() <{level = 10 : i32, message = "bqd,bkd->bqk"}> : () -> ()
    %cst_24 = arith.constant dense<0.000000e+00> : vector<2x16x16xf32>
    %91 = tpu.matmul %86, %88, %cst_24 {dimension_numbers = #tpu.dot_dimension_numbers<[2], [2], [1], [1], [0, 0, 0, 1, 1, 1], [0], [0]>} : vector<2x16x16xbf16>, vector<2x16x16xbf16>, vector<2x16x16xf32> -> vector<2x16x16xf32>
    "tpu.trace_stop"() : () -> ()
    %cst_25 = arith.constant 2.500000e-01 : f32
    %92 = vector.broadcast %cst_25 : f32 to vector<2x16x16xf32>
    %93 = arith.mulf %91, %92 : vector<2x16x16xf32>
    %cst_26 = arith.constant dense<0xFF800000> : vector<2x16xf32>
    %94 = vector.multi_reduction <maximumf>, %93, %cst_26 [2] : vector<2x16x16xf32> to vector<2x16xf32>
    %95 = vector.shape_cast %94 : vector<2x16xf32> to vector<2x16x1xf32>
    %96 = vector.broadcast %95 : vector<2x16x1xf32> to vector<2x16x16xf32>
    %97 = arith.subf %93, %96 : vector<2x16x16xf32>
    %98 = math.exp %97 : vector<2x16x16xf32>
    %cst_27 = arith.constant dense<0.000000e+00> : vector<2x16xf32>
    %99 = vector.multi_reduction <add>, %98, %cst_27 [2] : vector<2x16x16xf32> to vector<2x16xf32>
    %100 = vector.shape_cast %99 : vector<2x16xf32> to vector<2x16x1xf32>
    %101 = tpu.reciprocal %100 {approx = true} : vector<2x16x1xf32> -> vector<2x16x1xf32>
    %102 = vector.broadcast %101 : vector<2x16x1xf32> to vector<2x16x16xf32>
    %103 = arith.mulf %98, %102 : vector<2x16x16xf32>
    %104 = arith.truncf %103 : vector<2x16x16xf32> to vector<2x16x16xbf16>
    "tpu.trace_start"() <{level = 10 : i32, message = "bqk,bkd->bqd"}> : () -> ()
    %cst_28 = arith.constant dense<0.000000e+00> : vector<2x16x16xf32>
    %105 = tpu.matmul %104, %90, %cst_28 {dimension_numbers = #tpu.dot_dimension_numbers<[2], [1], [1], [2], [0, 0, 0, 1, 1, 2], [0], [0]>} : vector<2x16x16xbf16>, vector<2x16x16xbf16>, vector<2x16x16xf32> -> vector<2x16x16xf32>
    "tpu.trace_stop"() : () -> ()
    %106 = vector.shape_cast %105 : vector<2x16x16xf32> to vector<32x16xf32>
    %107 = arith.truncf %106 : vector<32x16xf32> to vector<32x16xbf16>
    %108 = vector.extract_strided_slice %5 {offsets = [48, 0], sizes = [16, 64], strides = [1, 1]} : vector<64x64xbf16> to vector<16x64xbf16>
    %cst_29 = arith.constant dense<0.000000e+00> : vector<32x64xf32>
    %109 = tpu.matmul %107, %108, %cst_29 {dimension_numbers = #tpu.dot_dimension_numbers<[1], [0], [0], [1], [0, 0, 1, 1], [], []>} : vector<32x16xbf16>, vector<16x64xbf16>, vector<32x64xf32> -> vector<32x64xf32>
    %110 = arith.addf %84, %109 : vector<32x64xf32>
    %c0_30 = arith.constant 0 : index
    %c0_31 = arith.constant 0 : index
    %111 = vector.load %arg4[%c0_30, %c0_31] : memref<1x64xf32, #tpu.memory_space<vmem>>, vector<1x64xf32>
    %112 = vector.broadcast %111 : vector<1x64xf32> to vector<32x64xf32>
    %113 = arith.addf %110, %112 : vector<32x64xf32>
    %114 = arith.addf %113, %0 : vector<32x64xf32>
    %c0_32 = arith.constant 0 : index
    %c0_33 = arith.constant 0 : index
    %115 = vector.load %arg9[%c0_32, %c0_33] : memref<1x64xf32, #tpu.memory_space<vmem>>, vector<1x64xf32>
    %c0_34 = arith.constant 0 : index
    %c0_35 = arith.constant 0 : index
    %116 = vector.load %arg10[%c0_34, %c0_35] : memref<1x64xf32, #tpu.memory_space<vmem>>, vector<1x64xf32>
    %cst_36 = arith.constant dense<0.000000e+00> : vector<32xf32>
    %117 = vector.multi_reduction <add>, %114, %cst_36 [1] : vector<32x64xf32> to vector<32xf32>
    %118 = vector.shape_cast %117 : vector<32xf32> to vector<32x1xf32>
    %cst_37 = arith.constant 6.400000e+01 : f32
    %119 = vector.broadcast %cst_37 : f32 to vector<32x1xf32>
    %120 = arith.divf %118, %119 : vector<32x1xf32>
    %121 = vector.broadcast %120 : vector<32x1xf32> to vector<32x64xf32>
    %122 = arith.subf %114, %121 : vector<32x64xf32>
    %123 = arith.mulf %122, %122 : vector<32x64xf32>
    %cst_38 = arith.constant dense<0.000000e+00> : vector<32xf32>
    %124 = vector.multi_reduction <add>, %123, %cst_38 [1] : vector<32x64xf32> to vector<32xf32>
    %125 = vector.shape_cast %124 : vector<32xf32> to vector<32x1xf32>
    %cst_39 = arith.constant 6.400000e+01 : f32
    %126 = vector.broadcast %cst_39 : f32 to vector<32x1xf32>
    %127 = arith.divf %125, %126 : vector<32x1xf32>
    %cst_40 = arith.constant 9.99999974E-6 : f32
    %128 = vector.broadcast %cst_40 : f32 to vector<32x1xf32>
    %129 = arith.addf %127, %128 : vector<32x1xf32>
    %130 = math.rsqrt %129 : vector<32x1xf32>
    %131 = vector.broadcast %130 : vector<32x1xf32> to vector<32x64xf32>
    %132 = arith.mulf %122, %131 : vector<32x64xf32>
    %133 = vector.broadcast %115 : vector<1x64xf32> to vector<32x64xf32>
    %134 = arith.mulf %132, %133 : vector<32x64xf32>
    %135 = vector.broadcast %116 : vector<1x64xf32> to vector<32x64xf32>
    %136 = arith.addf %134, %135 : vector<32x64xf32>
    %137 = arith.truncf %136 : vector<32x64xf32> to vector<32x64xbf16>
    %c0_41 = arith.constant 0 : index
    %c0_42 = arith.constant 0 : index
    %138 = vector.load %arg5[%c0_41, %c0_42] : memref<64x128xbf16, #tpu.memory_space<vmem>>, vector<64x128xbf16>
    %cst_43 = arith.constant dense<0.000000e+00> : vector<32x128xf32>
    %139 = tpu.matmul %137, %138, %cst_43 {dimension_numbers = #tpu.dot_dimension_numbers<[1], [0], [0], [1], [0, 0, 1, 1], [], []>} : vector<32x64xbf16>, vector<64x128xbf16>, vector<32x128xf32> -> vector<32x128xf32>
    %c0_44 = arith.constant 0 : index
    %c0_45 = arith.constant 0 : index
    %140 = vector.load %arg6[%c0_44, %c0_45] : memref<1x128xf32, #tpu.memory_space<vmem>>, vector<1x128xf32>
    %141 = vector.broadcast %140 : vector<1x128xf32> to vector<32x128xf32>
    %142 = arith.addf %139, %141 : vector<32x128xf32>
    %cst_46 = arith.constant 0.000000e+00 : f32
    %143 = vector.broadcast %cst_46 : f32 to vector<32x128xf32>
    %144 = arith.maximumf %142, %143 : vector<32x128xf32>
    %145 = arith.truncf %144 : vector<32x128xf32> to vector<32x128xbf16>
    %c0_47 = arith.constant 0 : index
    %c0_48 = arith.constant 0 : index
    %146 = vector.load %arg7[%c0_47, %c0_48] : memref<128x64xbf16, #tpu.memory_space<vmem>>, vector<128x64xbf16>
    %cst_49 = arith.constant dense<0.000000e+00> : vector<32x64xf32>
    %147 = tpu.matmul %145, %146, %cst_49 {dimension_numbers = #tpu.dot_dimension_numbers<[1], [0], [0], [1], [0, 0, 1, 1], [], []>} : vector<32x128xbf16>, vector<128x64xbf16>, vector<32x64xf32> -> vector<32x64xf32>
    %c0_50 = arith.constant 0 : index
    %c0_51 = arith.constant 0 : index
    %148 = vector.load %arg8[%c0_50, %c0_51] : memref<1x64xf32, #tpu.memory_space<vmem>>, vector<1x64xf32>
    %149 = vector.broadcast %148 : vector<1x64xf32> to vector<32x64xf32>
    %150 = arith.addf %147, %149 : vector<32x64xf32>
    %151 = arith.addf %150, %136 : vector<32x64xf32>
    %c0_52 = arith.constant 0 : index
    %c0_53 = arith.constant 0 : index
    %152 = vector.load %arg11[%c0_52, %c0_53] : memref<1x64xf32, #tpu.memory_space<vmem>>, vector<1x64xf32>
    %c0_54 = arith.constant 0 : index
    %c0_55 = arith.constant 0 : index
    %153 = vector.load %arg12[%c0_54, %c0_55] : memref<1x64xf32, #tpu.memory_space<vmem>>, vector<1x64xf32>
    %cst_56 = arith.constant dense<0.000000e+00> : vector<32xf32>
    %154 = vector.multi_reduction <add>, %151, %cst_56 [1] : vector<32x64xf32> to vector<32xf32>
    %155 = vector.shape_cast %154 : vector<32xf32> to vector<32x1xf32>
    %cst_57 = arith.constant 6.400000e+01 : f32
    %156 = vector.broadcast %cst_57 : f32 to vector<32x1xf32>
    %157 = arith.divf %155, %156 : vector<32x1xf32>
    %158 = vector.broadcast %157 : vector<32x1xf32> to vector<32x64xf32>
    %159 = arith.subf %151, %158 : vector<32x64xf32>
    %160 = arith.mulf %159, %159 : vector<32x64xf32>
    %cst_58 = arith.constant dense<0.000000e+00> : vector<32xf32>
    %161 = vector.multi_reduction <add>, %160, %cst_58 [1] : vector<32x64xf32> to vector<32xf32>
    %162 = vector.shape_cast %161 : vector<32xf32> to vector<32x1xf32>
    %cst_59 = arith.constant 6.400000e+01 : f32
    %163 = vector.broadcast %cst_59 : f32 to vector<32x1xf32>
    %164 = arith.divf %162, %163 : vector<32x1xf32>
    %cst_60 = arith.constant 9.99999974E-6 : f32
    %165 = vector.broadcast %cst_60 : f32 to vector<32x1xf32>
    %166 = arith.addf %164, %165 : vector<32x1xf32>
    %167 = math.rsqrt %166 : vector<32x1xf32>
    %168 = vector.broadcast %167 : vector<32x1xf32> to vector<32x64xf32>
    %169 = arith.mulf %159, %168 : vector<32x64xf32>
    %170 = vector.broadcast %152 : vector<1x64xf32> to vector<32x64xf32>
    %171 = arith.mulf %169, %170 : vector<32x64xf32>
    %172 = vector.broadcast %153 : vector<1x64xf32> to vector<32x64xf32>
    %173 = arith.addf %171, %172 : vector<32x64xf32>
    %c0_61 = arith.constant 0 : index
    %c0_62 = arith.constant 0 : index
    %174 = vector.load %arg13[%c0_61, %c0_62] : memref<32x64xf32, #tpu.memory_space<vmem>>, vector<32x64xf32>
    tpu.vector_store %arg13[%c0_61, %c0_62], %173 {strides = array<i32>} : memref<32x64xf32, #tpu.memory_space<vmem>>, vector<32x64xf32>,
    return
  }
  func.func @transform_0(%arg0: i32) -> (i32, i32) {
    %c0_i32 = arith.constant 0 : i32
    %c0_i32_0 = arith.constant 0 : i32
    return %arg0, %c0_i32 : i32, i32
  }
  func.func @transform_1(%arg0: i32) -> (i32, i32) {
    %c0_i32 = arith.constant 0 : i32
    %c0_i32_0 = arith.constant 0 : i32
    %c0_i32_1 = arith.constant 0 : i32
    return %c0_i32, %c0_i32_0 : i32, i32
  }
  func.func @transform_2(%arg0: i32) -> (i32, i32) {
    %c0_i32 = arith.constant 0 : i32
    %c0_i32_0 = arith.constant 0 : i32
    %c0_i32_1 = arith.constant 0 : i32
    return %c0_i32, %c0_i32_0 : i32, i32
  }
  func.func @transform_3(%arg0: i32) -> (i32, i32) {
    %c0_i32 = arith.constant 0 : i32
    %c0_i32_0 = arith.constant 0 : i32
    %c0_i32_1 = arith.constant 0 : i32
    return %c0_i32, %c0_i32_0 : i32, i32
  }
  func.func @transform_4(%arg0: i32) -> (i32, i32) {
    %c0_i32 = arith.constant 0 : i32
    %c0_i32_0 = arith.constant 0 : i32
    %c0_i32_1 = arith.constant 0 : i32
    return %c0_i32, %c0_i32_0 : i32, i32
  }
  func.func @transform_5(%arg0: i32) -> (i32, i32) {
    %c0_i32 = arith.constant 0 : i32
    %c0_i32_0 = arith.constant 0 : i32
    %c0_i32_1 = arith.constant 0 : i32
    return %c0_i32, %c0_i32_0 : i32, i32
  }
  func.func @transform_6(%arg0: i32) -> (i32, i32) {
    %c0_i32 = arith.constant 0 : i32
    %c0_i32_0 = arith.constant 0 : i32
    %c0_i32_1 = arith.constant 0 : i32
    return %c0_i32, %c0_i32_0 : i32, i32
  }
  func.func @transform_7(%arg0: i32) -> (i32, i32) {
    %c0_i32 = arith.constant 0 : i32
    %c0_i32_0 = arith.constant 0 : i32
    %c0_i32_1 = arith.constant 0 : i32
    return %c0_i32, %c0_i32_0 : i32, i32
  }
  func.func @transform_8(%arg0: i32) -> (i32, i32) {
    %c0_i32 = arith.constant 0 : i32
    %c0_i32_0 = arith.constant 0 : i32
    %c0_i32_1 = arith.constant 0 : i32
    return %c0_i32, %c0_i32_0 : i32, i32
  }
  func.func @transform_9(%arg0: i32) -> (i32, i32) {
    %c0_i32 = arith.constant 0 : i32
    %c0_i32_0 = arith.constant 0 : i32
    %c0_i32_1 = arith.constant 0 : i32
    return %c0_i32, %c0_i32_0 : i32, i32
  }
  func.func @transform_10(%arg0: i32) -> (i32, i32) {
    %c0_i32 = arith.constant 0 : i32
    %c0_i32_0 = arith.constant 0 : i32
    %c0_i32_1 = arith.constant 0 : i32
    return %c0_i32, %c0_i32_0 : i32, i32
  }
  func.func @transform_11(%arg0: i32) -> (i32, i32) {
    %c0_i32 = arith.constant 0 : i32
    %c0_i32_0 = arith.constant 0 : i32
    %c0_i32_1 = arith.constant 0 : i32
    return %c0_i32, %c0_i32_0 : i32, i32
  }
  func.func @transform_12(%arg0: i32) -> (i32, i32) {
    %c0_i32 = arith.constant 0 : i32
    %c0_i32_0 = arith.constant 0 : i32
    return %arg0, %c0_i32 : i32, i32
  }
}

</mosaic_0001>

<bundles_post_ra>
// kernel: tpu_custom_call.1
= control target key start
LH: loop header
LB: loop body
LE: loop exit
PB: predicated region body
PF: predicated region fallthrough
CT: control target
= control target key end

     0   :  { %17 = vsyncpa [#allocation3], 0  ;;  %s2776_s0 = inlined_call_operand.vmem [shape: f32[32,64], index: 0, kind: input, shape index: {}]   ;;  %s2777_s1 = inlined_call_operand.vmem [shape: bf16[64,192], index: 1, kind: input, shape index: {}]   ;;  %s2778_s2 = inlined_call_operand.hbm [shape: bf16[64,64], index: 2, kind: input, shape index: {}]   ;;  %s2779_s3 = inlined_call_operand.vmem [shape: f32[1,64], index: 3, kind: input, shape index: {}]   ;;  %s2780_s4 = inlined_call_operand.hbm [shape: bf16[64,128], index: 4, kind: input, shape index: {}]   ;;  %s2781_s5 = inlined_call_operand.vmem [shape: f32[1,128], index: 5, kind: input, shape index: {}]   ;;  %s2782_s6 = inlined_call_operand.vmem [shape: bf16[128,64], index: 6, kind: input, shape index: {}]   ;;  %s2783_s7 = inlined_call_operand.vmem [shape: f32[1,64], index: 7, kind: input, shape index: {}]   ;;  %s2784_s8 = inlined_call_operand.vmem [shape: f32[1,64], index: 8, kind: input, shape index: {}]   ;;  %s2785_s9 = inlined_call_operand.vmem [shape: f32[1,64], index: 9, kind: input, shape index: {}]   ;;  %s2786_s10 = inlined_call_operand.vmem [shape: f32[1,64], index: 10, kind: input, shape index: {}]   ;;  %s2787_s11 = inlined_call_operand.vmem [shape: f32[1,64], index: 11, kind: input, shape index: {}]   ;;  %s2788_s12 = inlined_call_operand.hbm [shape: f32[32,64], index: 12, kind: output, shape index: {}]  }
   0x1   :  { %18 = vsyncpa [#allocation6], 0 }
   0x2   :  { %19 = vsyncpa [#allocation4], 0  ;;  %s2327_s21 = smov [#allocation2]   ;;  %s2255_s25 = scalar_lea.hbm %s2778_s2, 512 }
   0x3   :  { %s29_s22 = sshll.u32 %s2327_s21, 4  ;;  %p2256_p0 = scmp.ne.s32.totalorder %s2778_s2, %s2255_s25  ;;  %s30_s22 = int_to_ptr.vmem [resolvable:$true] %s29_s22 }
   0x4   :  { %p2259_p1 = scmp.lt.u32.totalorder %s2255_s25, %s2778_s2 }
   0x6   :  { %p2261_p2 = pnand %p2259_p1, %p2256_p0 }
   0x8   :  { %2264 = shalt.err (!%p2261_p2)
}
   0x9   :  { %s2265_s30 = scalar_lea.vmem %s30_s22, 512  ;;  %p2270_p4 = scmp.lt.s32.totalorder %s30_s22, %s30_s22 }
   0xa   :  { %p2266_p3 = scmp.ne.s32.totalorder %s30_s22, %s2265_s30  ;;  %p2271_p5 = scmp.lt.s32.totalorder %s2265_s30, %s2265_s30 }
   0xc   :  { %p2272_p6 = por %p2271_p5, %p2270_p4 }
   0xe   :  { %p2273_p7 = pnand %p2272_p6, %p2266_p3 }
  0x10   :  { %2276 = shalt.err (!%p2273_p7)
}
  0x11   :  { %s2328_s13 = smov 64   ;;  %s2329_s14 = smov 4  }
  0x12   :  { %35 = dma.hbm_to_vmem [thread:$0]  %s2778_s2, 512, %s30_s22, [#allocation3], %s2328_s13, %s2328_s13, %s2329_s14  }
  0x13   :  { %s2330_s17 = smov [#allocation5]   ;;  %s2277_s21 = scalar_lea.hbm %s2780_s4, 512 }
  0x14   :  { %s43_s18 = sshll.u32 %s2330_s17, 4  ;;  %p2278_p8 = scmp.ne.s32.totalorder %s2780_s4, %s2277_s21  ;;  %s44_s18 = int_to_ptr.vmem [resolvable:$true] %s43_s18 }
  0x15   :  { %p2281_p9 = scmp.lt.u32.totalorder %s2277_s21, %s2780_s4 }
  0x17   :  { %p2283_p10 = pnand %p2281_p9, %p2278_p8 }
  0x19   :  { %2286 = shalt.err (!%p2283_p10)
}
  0x1a   :  { %s2287_s27 = scalar_lea.vmem %s44_s18, 512  ;;  %p2292_p12 = scmp.lt.s32.totalorder %s44_s18, %s44_s18 }
  0x1b   :  { %p2288_p11 = scmp.ne.s32.totalorder %s44_s18, %s2287_s27  ;;  %p2293_p13 = scmp.lt.s32.totalorder %s2287_s27, %s2287_s27 }
  0x1d   :  { %p2294_p0 = por %p2293_p13, %p2292_p12 }
  0x1f   :  { %p2295_p1 = pnand %p2294_p0, %p2288_p11 }
  0x21   :  { %2298 = shalt.err (!%p2295_p1)
}
  0x22   :  { %49 = dma.hbm_to_vmem [thread:$0]  %s2780_s4, 512, %s44_s18, [#allocation6], %s2328_s13, %s2328_s13, %s2329_s14  }
  0x23   :  { %2321 = dma.done.wait [#allocation3], 512  }
  0x24   :  { %2322 = vsyncadd [#allocation3], 4294966784 }
  0x25   :  { %2323 = dma.done.wait [#allocation6], 512  }
  0x26   :  { %2324 = vsyncadd [#allocation6], 4294966784  ;;  %v2331_v0 = vmov 0   ;;  %v2147_v1 = vld [vmem:[%s2777_s1 + $0x4] ss:$8 sps:$4 sm:$0xff]   ;;  %vm125_vm0 = vcmask 523264  }
  0x27   :  { %164 = vmatprep.mubr.bf16.mxu0 %v2331_v0  ;;  %v2149_v2 = vld [vmem:[%s2777_s1] ss:$8 sps:$4 sm:$0xff]   ;;  %132 = vmatprep.subr.bf16.mxu0 %v2147_v1  ;;  %v2150_v3 = vld [vmem:[%s2777_s1 + $0x14] ss:$8 sps:$4 sm:$0xff]   ;;  %v2152_v4 = vld [vmem:[%s2777_s1 + $0x10] ss:$8 sps:$4 sm:$0xff]  }
  0x28   :  { %133 = vmatpush1.bf16.msra.mxu0 %v2149_v2  ;;  %v2153_v5 = vld [vmem:[%s2777_s1 + $0x24] ss:$8 sps:$4 sm:$0xff]   ;;  %v2155_v6 = vld [vmem:[%s2777_s1 + $0x20] ss:$8 sps:$4 sm:$0xff]   ;;  %v2156_v7 = vld [vmem:[%s2777_s1 + $0x34] ss:$8 sps:$4 sm:$0xff]  }
  0x29   :  { %134 = vmatprep.subr.bf16.mxu0 %v2150_v3  ;;  %v2158_v8 = vld [vmem:[%s2777_s1 + $0x30] ss:$8 sps:$4 sm:$0xff]   ;;  %v2463_v9 = vld [vmem:[%s2776_s0] sm:$0xff]  ;;  %v2468_v10 = vld [vmem:[%s2776_s0 + $0x8] sm:$0xff]  ;;  %v2332_v16 = vmov 0.0   ;;  %vm2333_vm1 = vmmov 0  }
  0x2a   :  { %v75_v11 = vpack.c.bf16 %v2468_v10, %v2463_v9  ;;  %v2476_v12 = vld [vmem:[%s2776_s0 + $0x10] sm:$0xff]  ;;  %v2481_v13 = vld [vmem:[%s2776_s0 + $0x18] sm:$0xff]  ;;  %1973 = vmatprep.subr.bf16.mxu1 %v2332_v16  ;;  %1975 = vmatprep.mubr.msk.bf16.mxu1 %vm2333_vm1, %v2332_v16  ;;  %vm200_vm2 = vcmask 130048   ;;  %s2334_s0 = smov 48   ;;  %s2336_s16 = smov 32  }
  0x2b   :  { %v76_v14 = vpack.c.bf16 %v2481_v13, %v2476_v12  ;;  %s2337_s17 = smov 96   ;;  %s2338_s4 = smov 16  }
  0x2c   :  { %135 = vmatpush1.bf16.msra.mxu0 %v2152_v4  ;;  %s2339_s14 = smov 80  }
  0x2d   :  { %136 = vmatprep.subr.bf16.mxu0 %v2153_v5 }
  0x30   :  { %137 = vmatpush1.bf16.msra.mxu0 %v2155_v6 }
  0x31   :  { %138 = vmatprep.subr.bf16.mxu0 %v2156_v7 }
  0x34   :  { %139 = vmatpush1.bf16.msra.mxu0 %v2158_v8 }
  0x35   :  { %1967 = vmatprep.subr.bf16.mxu0 %v2332_v16 }
  0x37   :  { %1856 = vmatmul.mubr.msk.bf16.vlgmr.msra.gmra.mrb[0].mxu0 %vm125_vm0, %v75_v11 }
  0x38   :  { %174 = vmatprep.mubr.bf16.mxu0 %v2331_v0 }
  0x3f   :  { %1857 = vmatmul.mubr.msk.bf16.gmra.mrb[4].mxu0 %vm125_vm0, %v76_v14 }
  0x40   :  { %1969 = vmatprep.mubr.msk.bf16.mxu0 %vm2333_vm1, %v2332_v16 }
 0x10a   :  { %v166_v15 = vpop.f32.mrb[0].mxu0 }
 0x10b   :  { %v168_v17 = vpop.f32.mrb[1].mxu0 }
 0x10c   :  { %v170_v18 = vpop.f32.mrb[2].mxu0 }
 0x10d   :  { %v2488_v19 = vpack.c.bf16 %v170_v18, %v166_v15  ;;  %v172_v20 = vpop.f32.mrb[3].mxu0 }
 0x10e   :  { %v2490_v21 = vpack.c.bf16 %v172_v20, %v168_v17 }
 0x112   :  { %v176_v22 = vpop.f32.mrb[4].mxu0 }
 0x113   :  { %v178_v23 = vpop.f32.mrb[5].mxu0 }
 0x114   :  { %v180_v24 = vpop.f32.mrb[6].mxu0 }
 0x115   :  { %v2496_v25 = vpack.c.bf16 %v180_v24, %v176_v22  ;;  %v182_v26 = vpop.f32.mrb[7].mxu0 }
 0x116   :  { %v2498_v27 = vpack.c.bf16 %v182_v26, %v178_v23 }
 0x117   :  { %249 = vrot.lane.b32.xlu0 %v2496_v25, %s2328_s13 }
 0x11b   :  { %198 = vrot.lane.b32.xlu0 %v2488_v19, %s2328_s13  ;;  %s2335_s13 = smov 112  }
 0x189   :  { %v250_v28 = vpop.permute.xlu0 %249 }
 0x18a   :  { %v255_v29 = vsel %vm200_vm2, %v250_v28, 0 }
 0x18b   :  { %1974 = vmatpush3.bf16.xpose.msra.mxu1 %v255_v29 }
 0x18c   :  { %1979 = vmatprep.subr.bf16.mxu1 %v2332_v16 }
 0x18d   :  { %v199_v30 = vpop.permute.xlu0 %198 }
 0x18e   :  { %v205_v31 = vsel %vm200_vm2, %v199_v30, 0 }
 0x18f   :  { %1968 = vmatpush3.bf16.xpose.msra.mxu0 %v205_v31 }
 0x190   :  { %1985 = vmatprep.subr.bf16.mxu0 %v2332_v16 }
 0x192   :  { %1976 = vmatmul.mubr.msk.bf16.vlgmr.msra.gmra.mrb[0].mxu1 %vm200_vm2, %v2496_v25 }
 0x193   :  { %1980 = vmatpush3.bf16.msra.mxu1 %v2490_v21  ;;  %1981 = vmatprep.mubr.msk.bf16.mxu1 %vm2333_vm1, %v2332_v16 }
 0x194   :  { %1991 = vmatprep.subr.bf16.mxu1 %v2332_v16 }
 0x196   :  { %1970 = vmatmul.mubr.msk.bf16.vlgmr.msra.gmra.mrb[8].mxu0 %vm200_vm2, %v2488_v19 }
 0x197   :  { %1986 = vmatpush3.bf16.msra.mxu0 %v2498_v27  ;;  %1987 = vmatprep.mubr.msk.bf16.mxu0 %vm2333_vm1, %v2332_v16 }
 0x198   :  { %1997 = vmatprep.subr.bf16.mxu0 %v2332_v16 }
 0x265   :  { %v291_v32 = vpop.f32.mrb[0].mxu1 }
 0x266   :  { %v300_v33 = vmul.f32 0.25, %v291_v32  ;;  %v1977_v34 = vpop.f32.mrb[1].mxu1 }
 0x267   :  { %v294_v35 = vpop.f32.mrb[2].mxu1 }
 0x268   :  { %v301_v36 = vmul.f32 0.25, %v294_v35  ;;  %v1978_v37 = vpop.f32.mrb[3].mxu1  ;;  %v308_v38 = vsel %vm200_vm2, %v300_v33, -inf }
 0x269   :  { %309 = vmax.xlane.f32.xlu1 %v308_v38  ;;  %v241_v39 = vpop.f32.mrb[8].mxu0 }
 0x26a   :  { %v1971_v40 = vpop.f32.mrb[9].mxu0  ;;  %v311_v43 = vsel %vm200_vm2, %v301_v36, -inf  ;;  %v298_v56 = vmul.f32 0.25, %v241_v39 }
 0x26b   :  { %v244_v41 = vpop.f32.mrb[10].mxu0 }
 0x26c   :  { %v1972_v42 = vpop.f32.mrb[11].mxu0  ;;  %v299_v51 = vmul.f32 0.25, %v244_v41  ;;  %v302_v57 = vsel %vm200_vm2, %v298_v56, -inf }
 0x26d   :  { %312 = vmax.xlane.f32.xlu1 %v311_v43 }
 0x26e   :  { %v305_v55 = vsel %vm200_vm2, %v299_v51, -inf }
 0x2f6   :  { %v310_v44 = vpop.xlane.xlu1 %309 }
 0x2f7   :  { %v316_v45 = vsub.f32 %v300_v33, %v310_v44 }
 0x2f9   :  { %v322_v46 = vmul.f32 1.442695, %v316_v45 }
 0x2fa   :  { %v313_v47 = vpop.xlane.xlu1 %312 }
 0x2fb   :  { %2175 = vpow2.f32 %v322_v46  ;;  %v317_v48 = vsub.f32 %v301_v36, %v313_v47 }
 0x2fd   :  { %v324_v49 = vmul.f32 1.442695, %v317_v48 }
 0x2ff   :  { %2177 = vpow2.f32 %v324_v49 }
 0x305   :  { %v2176_v50 = vpop.eup %2175 }
 0x306   :  { %v332_v52 = vsel %vm200_vm2, %v2176_v50, 0.0 }
 0x307   :  { %333 = vadd.xlane.f32.xlu0 %v332_v52 }
 0x309   :  { %v2178_v53 = vpop.eup %2177 }
 0x30a   :  { %v335_v54 = vsel %vm200_vm2, %v2178_v53, 0.0 }
 0x30b   :  { %336 = vadd.xlane.f32.xlu1 %v335_v54  ;;  %306 = vmax.xlane.f32.xlu0 %v305_v55 }
 0x31c   :  { %491 = vrot.lane.b32.xlu1 %v2496_v25, %s2334_s0 }
 0x320   :  { %489 = vrot.lane.b32.xlu1 %v2496_v25, %s2335_s13 }
 0x344   :  { %303 = vmax.xlane.f32.xlu1 %v302_v57 }
 0x355   :  { %438 = vrot.lane.b32.xlu1 %v2488_v19, %s2335_s13 }
 0x394   :  { %v334_v58 = vpop.xlane.xlu0 %333 }
 0x395   :  { %2179 = vrcp.f32 %v334_v58 }
 0x398   :  { %v337_v59 = vpop.xlane.xlu1 %336  ;;  %v307_v4 = vpop.xlane.xlu0 %306 }
 0x399   :  { %2181 = vrcp.f32 %v337_v59  ;;  %v315_v5 = vsub.f32 %v299_v51, %v307_v4 }
 0x39b   :  { %v320_v8 = vmul.f32 1.442695, %v315_v5 }
 0x39c   :  { %v492_v0 = vpop.permute.xlu1 %491 }
 0x39d   :  { %v497_v2 = vsel %vm200_vm2, %v492_v0, 0 }
 0x39f   :  { %v2180_v60 = vpop.eup %2179 }
 0x3a0   :  { %v344_v62 = vmul.f32 %v2180_v60, %v2176_v50  ;;  %v490_v3 = vpop.permute.xlu1 %489 }
 0x3a3   :  { %v2182_v61 = vpop.eup %2181 }
 0x3a4   :  { %v345_v63 = vmul.f32 %v2182_v61, %v2178_v53 }
 0x3a6   :  { %v347_v1 = vpack.c.bf16 %v345_v63, %v344_v62 }
 0x3a8   :  { %1988 = vmatmul.mubr.msk.bf16.vlgmr.msra.gmra.mrb[12].mxu0 %vm200_vm2, %v347_v1 }
 0x3a9   :  { %1998 = vmatpush3.bf16.xpose.msra.mxu0 %v497_v2  ;;  %1999 = vmatprep.mubr.msk.bf16.mxu0 %vm2333_vm1, %v2332_v16 }
 0x3aa   :  { %2009 = vmatprep.subr.bf16.mxu0 %v2332_v16 }
 0x3b0   :  { %2000 = vmatmul.mubr.msk.bf16.vlgmr.msra.gmra.mrb[16].mxu0 %vm200_vm2, %v490_v3 }
 0x3b1   :  { %2011 = vmatprep.mubr.msk.bf16.mxu0 %vm2333_vm1, %v2332_v16 }
 0x3d1   :  { %v304_v6 = vpop.xlane.xlu1 %303 }
 0x3d2   :  { %v314_v7 = vsub.f32 %v298_v56, %v304_v6 }
 0x3d4   :  { %v318_v11 = vmul.f32 1.442695, %v314_v7 }
 0x3d5   :  { %v439_v45 = vpop.permute.xlu1 %438 }
 0x3d6   :  { %2183 = vpow2.f32 %v318_v11 }
 0x3d7   :  { %2185 = vpow2.f32 %v320_v8 }
 0x3e0   :  { %v2184_v14 = vpop.eup %2183 }
 0x3e1   :  { %v326_v15 = vsel %vm200_vm2, %v2184_v14, 0.0  ;;  %v2186_v17 = vpop.eup %2185 }
 0x3e2   :  { %327 = vadd.xlane.f32.xlu0 %v326_v15  ;;  %v329_v18 = vsel %vm200_vm2, %v2186_v17, 0.0 }
 0x3e6   :  { %330 = vadd.xlane.f32.xlu0 %v329_v18 }
 0x3fc   :  { %440 = vrot.lane.b32.xlu0 %v2488_v19, %s2334_s0 }
 0x46f   :  { %v328_v20 = vpop.xlane.xlu0 %327 }
 0x470   :  { %2187 = vrcp.f32 %v328_v20 }
 0x473   :  { %v331_v22 = vpop.xlane.xlu0 %330 }
 0x474   :  { %2189 = vrcp.f32 %v331_v22 }
 0x477   :  { %v441_v34 = vpop.permute.xlu0 %440 }
 0x478   :  { %v446_v36 = vsel %vm200_vm2, %v441_v34, 0 }
 0x47a   :  { %v2188_v24 = vpop.eup %2187 }
 0x47b   :  { %v2544_v23 = vpop.f32.mrb[12].mxu0  ;;  %v342_v32 = vmul.f32 %v2188_v24, %v2184_v14 }
 0x47c   :  { %v1989_v26 = vpop.f32.mrb[13].mxu0 }
 0x47d   :  { %v2546_v28 = vpop.f32.mrb[14].mxu0 }
 0x47e   :  { %v2190_v29 = vpop.eup %2189  ;;  %v437_v30 = vpack.c.bf16 %v2546_v28, %v2544_v23  ;;  %v1990_v31 = vpop.f32.mrb[15].mxu0 }
 0x47f   :  { %v343_v33 = vmul.f32 %v2190_v29, %v2186_v17 }
 0x481   :  { %v346_v35 = vpack.c.bf16 %v343_v33, %v342_v32 }
 0x483   :  { %1982 = vmatmul.mubr.msk.bf16.vlgmr.msra.gmra.mrb[4].mxu1 %vm200_vm2, %v346_v35  ;;  %v533_v37 = vpop.f32.mrb[16].mxu0 }
 0x484   :  { %1992 = vmatpush3.bf16.xpose.msra.mxu1 %v446_v36  ;;  %v542_v38 = vmul.f32 0.25, %v533_v37  ;;  %v2001_v39 = vpop.f32.mrb[17].mxu0  ;;  %1993 = vmatprep.mubr.msk.bf16.mxu1 %vm2333_vm1, %v2332_v16 }
 0x485   :  { %v536_v40 = vpop.f32.mrb[18].mxu0  ;;  %2003 = vmatprep.subr.bf16.mxu1 %v2332_v16 }
 0x486   :  { %v543_v41 = vmul.f32 0.25, %v536_v40  ;;  %v2002_v42 = vpop.f32.mrb[19].mxu0  ;;  %v550_v43 = vsel %vm200_vm2, %v542_v38, -inf }
 0x487   :  { %551 = vmax.xlane.f32.xlu0 %v550_v43 }
 0x488   :  { %v553_v44 = vsel %vm200_vm2, %v543_v41, -inf }
 0x489   :  { %554 = vmax.xlane.f32.xlu1 %v553_v44 }
 0x48b   :  { %1994 = vmatmul.mubr.msk.bf16.vlgmr.msra.gmra.mrb[8].mxu1 %vm200_vm2, %v439_v45 }
 0x48c   :  { %2005 = vmatprep.mubr.msk.bf16.mxu1 %vm2333_vm1, %v2332_v16 }
 0x49a   :  { %812 = vrot.lane.b32.xlu1 %v2488_v19, %s2336_s16 }
 0x49e   :  { %861 = vrot.lane.b32.xlu1 %v2496_v25, %s2337_s17 }
 0x514   :  { %v552_v46 = vpop.xlane.xlu0 %551 }
 0x515   :  { %v558_v47 = vsub.f32 %v542_v38, %v552_v46 }
 0x516   :  { %v555_v48 = vpop.xlane.xlu1 %554 }
 0x517   :  { %v564_v49 = vmul.f32 1.442695, %v558_v47  ;;  %v559_v50 = vsub.f32 %v543_v41, %v555_v48 }
 0x519   :  { %2191 = vpow2.f32 %v564_v49  ;;  %v566_v51 = vmul.f32 1.442695, %v559_v50 }
 0x51a   :  { %v813_v17 = vpop.permute.xlu1 %812 }
 0x51b   :  { %2193 = vpow2.f32 %v566_v51  ;;  %v818_v22 = vsel %vm200_vm2, %v813_v17, 0 }
 0x51e   :  { %v862_v29 = vpop.permute.xlu1 %861 }
 0x523   :  { %v2192_v52 = vpop.eup %2191 }
 0x524   :  { %v574_v53 = vsel %vm200_vm2, %v2192_v52, 0.0 }
 0x525   :  { %v2194_v54 = vpop.eup %2193  ;;  %575 = vadd.xlane.f32.xlu0 %v574_v53 }
 0x526   :  { %v577_v55 = vsel %vm200_vm2, %v2194_v54, 0.0 }
 0x529   :  { %578 = vadd.xlane.f32.xlu0 %v577_v55 }
 0x53f   :  { %639 = vrot.lane.b32.xlu0 %v2498_v27, %s2335_s13 }
 0x543   :  { %810 = vrot.lane.b32.xlu0 %v2488_v19, %s2337_s17 }
 0x547   :  { %863 = vrot.lane.b32.xlu0 %v2496_v25, %s2336_s16 }
 0x556   :  { %v2570_v56 = vpop.f32.mrb[4].mxu1 }
 0x557   :  { %v1983_v57 = vpop.f32.mrb[5].mxu1 }
 0x558   :  { %v2572_v58 = vpop.f32.mrb[6].mxu1 }
 0x559   :  { %v436_v59 = vpack.c.bf16 %v2572_v58, %v2570_v56  ;;  %v1984_v60 = vpop.f32.mrb[7].mxu1 }
 0x55e   :  { %v482_v61 = vpop.f32.mrb[8].mxu1 }
 0x55f   :  { %v1995_v62 = vpop.f32.mrb[9].mxu1  ;;  %v540_v0 = vmul.f32 0.25, %v482_v61 }
 0x560   :  { %v485_v63 = vpop.f32.mrb[10].mxu1 }
 0x561   :  { %v541_v1 = vmul.f32 0.25, %v485_v63  ;;  %v1996_v2 = vpop.f32.mrb[11].mxu1  ;;  %v544_v4 = vsel %vm200_vm2, %v540_v0, -inf }
 0x563   :  { %v547_v3 = vsel %vm200_vm2, %v541_v1, -inf }
 0x564   :  { %548 = vmax.xlane.f32.xlu1 %v547_v3 }
 0x566   :  { %545 = vmax.xlane.f32.xlu0 %v544_v4 }
 0x575   :  { %591 = vrot.lane.b32.xlu1 %v2490_v21, %s2335_s13 }
 0x5b2   :  { %v576_v5 = vpop.xlane.xlu0 %575 }
 0x5b3   :  { %2195 = vrcp.f32 %v576_v5 }
 0x5b6   :  { %v579_v6 = vpop.xlane.xlu0 %578 }
 0x5b7   :  { %2197 = vrcp.f32 %v579_v6 }
 0x5ba   :  { %v640_v7 = vpop.permute.xlu0 %639 }
 0x5bb   :  { %2010 = vmatpush3.bf16.msra.mxu0 %v640_v7 }
 0x5bc   :  { %2027 = vmatprep.subr.bf16.mxu0 %v2332_v16 }
 0x5bd   :  { %v2196_v8 = vpop.eup %2195 }
 0x5be   :  { %v586_v14 = vmul.f32 %v2196_v8, %v2192_v52  ;;  %v811_v20 = vpop.permute.xlu0 %810 }
 0x5c1   :  { %v2198_v11 = vpop.eup %2197 }
 0x5c2   :  { %v587_v15 = vmul.f32 %v2198_v11, %v2194_v54  ;;  %v864_v24 = vpop.permute.xlu0 %863  ;;  %v2159_v11 = vld [vmem:[#allocation2 + $0x8] sm:$0xff]  }
 0x5c3   :  { %v869_v26 = vsel %vm200_vm2, %v864_v24, 0 }
 0x5c4   :  { %v589_v18 = vpack.c.bf16 %v587_v15, %v586_v14  ;;  %v2160_v14 = vld [vmem:[#allocation2] sm:$0xff]  }
 0x5c6   :  { %2012 = vmatmul.mubr.msk.bf16.vlgmr.msra.gmra.mrb[20].mxu0 %vm200_vm2, %v589_v18 }
 0x5c7   :  { %2028 = vmatpush3.bf16.xpose.msra.mxu0 %v818_v22  ;;  %2029 = vmatprep.mubr.msk.bf16.mxu0 %vm2333_vm1, %v2332_v16 }
 0x5c8   :  { %2033 = vmatprep.subr.bf16.mxu0 %v2332_v16 }
 0x5ce   :  { %2030 = vmatmul.mubr.msk.bf16.vlgmr.msra.gmra.mrb[24].mxu0 %vm200_vm2, %v811_v20 }
 0x5cf   :  { %2034 = vmatpush3.bf16.xpose.msra.mxu0 %v869_v26  ;;  %2035 = vmatprep.mubr.msk.bf16.mxu0 %vm2333_vm1, %v2332_v16 }
 0x5d0   :  { %2045 = vmatprep.subr.bf16.mxu0 %v2332_v16 }
 0x5d6   :  { %2036 = vmatmul.mubr.msk.bf16.vlgmr.msra.gmra.mrb[28].mxu0 %vm200_vm2, %v862_v29 }
 0x5d7   :  { %2047 = vmatprep.mubr.msk.bf16.mxu0 %vm2333_vm1, %v2332_v16 }
 0x5f1   :  { %v549_v31 = vpop.xlane.xlu1 %548 }
 0x5f2   :  { %v557_v32 = vsub.f32 %v541_v1, %v549_v31 }
 0x5f3   :  { %v546_v33 = vpop.xlane.xlu0 %545 }
 0x5f4   :  { %v556_v34 = vsub.f32 %v540_v0, %v546_v33  ;;  %v562_v36 = vmul.f32 1.442695, %v557_v32 }
 0x5f5   :  { %v592_v35 = vpop.permute.xlu1 %591 }
 0x5f6   :  { %v560_v37 = vmul.f32 1.442695, %v556_v34  ;;  %2004 = vmatpush3.bf16.msra.mxu1 %v592_v35 }
 0x5f7   :  { %2015 = vmatprep.subr.bf16.mxu1 %v2159_v11 }
 0x5f8   :  { %2199 = vpow2.f32 %v560_v37 }
 0x5f9   :  { %2201 = vpow2.f32 %v562_v36 }
 0x602   :  { %v2200_v38 = vpop.eup %2199 }
 0x603   :  { %v568_v39 = vsel %vm200_vm2, %v2200_v38, 0.0  ;;  %v2202_v40 = vpop.eup %2201 }
 0x604   :  { %569 = vadd.xlane.f32.xlu0 %v568_v39  ;;  %v571_v41 = vsel %vm200_vm2, %v2202_v40, 0.0 }
 0x608   :  { %572 = vadd.xlane.f32.xlu0 %v571_v41 }
 0x691   :  { %v570_v42 = vpop.xlane.xlu0 %569 }
 0x692   :  { %2203 = vrcp.f32 %v570_v42 }
 0x695   :  { %v573_v43 = vpop.xlane.xlu0 %572 }
 0x696   :  { %2205 = vrcp.f32 %v573_v43 }
 0x699   :  { %v2596_v44 = vpop.f32.mrb[20].mxu0 }
 0x69a   :  { %v2013_v45 = vpop.f32.mrb[21].mxu0 }
 0x69b   :  { %v2598_v46 = vpop.f32.mrb[22].mxu0 }
 0x69c   :  { %v687_v47 = vpack.c.bf16 %v2598_v46, %v2596_v44  ;;  %v2014_v48 = vpop.f32.mrb[23].mxu0  ;;  %v2204_v49 = vpop.eup %2203 }
 0x69d   :  { %v584_v51 = vmul.f32 %v2204_v49, %v2200_v38 }
 0x6a0   :  { %v2206_v50 = vpop.eup %2205 }
 0x6a1   :  { %v585_v52 = vmul.f32 %v2206_v50, %v2202_v40  ;;  %v854_v53 = vpop.f32.mrb[24].mxu0 }
 0x6a2   :  { %v912_v54 = vmul.f32 0.25, %v854_v53  ;;  %v2031_v55 = vpop.f32.mrb[25].mxu0 }
 0x6a3   :  { %v857_v57 = vpop.f32.mrb[26].mxu0  ;;  %v588_v60 = vpack.c.bf16 %v585_v52, %v584_v51 }
 0x6a4   :  { %v913_v61 = vmul.f32 0.25, %v857_v57  ;;  %v2032_v62 = vpop.f32.mrb[27].mxu0  ;;  %v916_v63 = vsel %vm200_vm2, %v912_v54, -inf }
 0x6a5   :  { %2006 = vmatmul.mubr.msk.bf16.vlgmr.msra.gmra.mrb[12].mxu1 %vm200_vm2, %v588_v60  ;;  %917 = vmax.xlane.f32.xlu0 %v916_v63  ;;  %v2161_v63 = vld [vmem:[#allocation2 + $0x10] sm:$0xff]  }
 0x6a6   :  { %v919_v0 = vsel %vm200_vm2, %v913_v61, -inf  ;;  %2016 = vmatpush3.bf16.msra.mxu1 %v2159_v11 }
 0x6a7   :  { %2021 = vmatprep.subr.bf16.mxu1 %v2160_v14 }
 0x6a9   :  { %920 = vmax.xlane.f32.xlu0 %v919_v0  ;;  %v905_v1 = vpop.f32.mrb[28].mxu0 }
 0x6aa   :  { %v914_v2 = vmul.f32 0.25, %v905_v1  ;;  %v2037_v3 = vpop.f32.mrb[29].mxu0 }
 0x6ab   :  { %v908_v4 = vpop.f32.mrb[30].mxu0 }
 0x6ac   :  { %v915_v5 = vmul.f32 0.25, %v908_v4  ;;  %v2038_v6 = vpop.f32.mrb[31].mxu0  ;;  %v922_v7 = vsel %vm200_vm2, %v914_v2, -inf }
 0x6ad   :  { %923 = vmax.xlane.f32.xlu0 %v922_v7 }
 0x6ae   :  { %v925_v8 = vsel %vm200_vm2, %v915_v5, -inf }
 0x6b1   :  { %926 = vmax.xlane.f32.xlu0 %v925_v8 }
 0x6c7   :  { %962 = vrot.lane.b32.xlu0 %v2490_v21, %s2337_s17 }
 0x732   :  { %v918_v15 = vpop.xlane.xlu0 %917 }
 0x733   :  { %v928_v17 = vsub.f32 %v912_v54, %v918_v15 }
 0x735   :  { %v932_v18 = vmul.f32 1.442695, %v928_v17 }
 0x736   :  { %v921_v20 = vpop.xlane.xlu0 %920 }
 0x737   :  { %2207 = vpow2.f32 %v932_v18  ;;  %v929_v22 = vsub.f32 %v913_v61, %v921_v20 }
 0x739   :  { %v934_v24 = vmul.f32 1.442695, %v929_v22 }
 0x73a   :  { %v924_v26 = vpop.xlane.xlu0 %923 }
 0x73b   :  { %2209 = vpow2.f32 %v934_v24  ;;  %v930_v29 = vsub.f32 %v914_v2, %v924_v26 }
 0x73d   :  { %v936_v31 = vmul.f32 1.442695, %v930_v29 }
 0x73e   :  { %v927_v32 = vpop.xlane.xlu0 %926 }
 0x73f   :  { %2211 = vpow2.f32 %v936_v31  ;;  %v931_v33 = vsub.f32 %v915_v5, %v927_v32 }
 0x741   :  { %v2208_v34 = vpop.eup %2207  ;;  %v938_v35 = vmul.f32 1.442695, %v931_v33 }
 0x742   :  { %v940_v36 = vsel %vm200_vm2, %v2208_v34, 0.0 }
 0x743   :  { %2213 = vpow2.f32 %v938_v35  ;;  %941 = vadd.xlane.f32.xlu1 %v940_v36 }
 0x745   :  { %v2210_v37 = vpop.eup %2209 }
 0x746   :  { %v943_v38 = vsel %vm200_vm2, %v2210_v37, 0.0 }
 0x747   :  { %944 = vadd.xlane.f32.xlu0 %v943_v38 }
 0x749   :  { %v2212_v39 = vpop.eup %2211 }
 0x74a   :  { %v946_v40 = vsel %vm200_vm2, %v2212_v39, 0.0 }
 0x74b   :  { %947 = vadd.xlane.f32.xlu0 %v946_v40 }
 0x74d   :  { %v2214_v41 = vpop.eup %2213 }
 0x74e   :  { %v949_v42 = vsel %vm200_vm2, %v2214_v41, 0.0 }
 0x74f   :  { %950 = vadd.xlane.f32.xlu0 %v949_v42 }
 0x754   :  { %1125 = vrot.lane.b32.xlu1 %v2488_v19, %s2338_s4 }
 0x765   :  { %1009 = vrot.lane.b32.xlu0 %v2498_v27, %s2337_s17 }
 0x769   :  { %1176 = vrot.lane.b32.xlu0 %v2496_v25, %s2338_s4 }
 0x76d   :  { %1123 = vrot.lane.b32.xlu0 %v2488_v19, %s2339_s14  ;;  %v963_v19 = vpop.permute.xlu0 %962 }
 0x771   :  { %1174 = vrot.lane.b32.xlu0 %v2496_v25, %s2339_s14 }
 0x778   :  { %v631_v43 = vpop.f32.mrb[12].mxu1 }
 0x779   :  { %v2007_v45 = vpop.f32.mrb[13].mxu1 }
 0x77a   :  { %v634_v48 = vpop.f32.mrb[14].mxu1 }
 0x77b   :  { %v686_v49 = vpack.c.bf16 %v634_v48, %v631_v43  ;;  %v2008_v50 = vpop.f32.mrb[15].mxu1 }
 0x77d   :  { %2017 = vmatprep.mubr.msk.bf16.mxu1 %vm200_vm2, %v686_v49 }
 0x77e   :  { %2018 = vmatmul.mubr.msk.bf16.vlgmr.msra.gmra.mrb[16].mxu1 %vm200_vm2, %v687_v47 }
 0x77f   :  { %2023 = vmatprep.mubr.msk.bf16.mxu1 %vm200_vm2, %v436_v59  ;;  %2022 = vmatpush3.bf16.msra.mxu1 %v2160_v14 }
 0x780   :  { %2039 = vmatprep.subr.bf16.mxu1 %v2332_v16 }
 0x78a   :  { %2024 = vmatmul.mubr.msk.bf16.vlgmr.msra.gmra.mrb[16].mxu1 %vm200_vm2, %v437_v30 }
 0x78b   :  { %2040 = vmatpush3.bf16.msra.mxu1 %v963_v19  ;;  %2041 = vmatprep.mubr.msk.bf16.mxu1 %vm2333_vm1, %v2332_v16 }
 0x78c   :  { %2051 = vmatprep.subr.bf16.mxu1 %v2161_v63 }
 0x7d0   :  { %v942_v25 = vpop.xlane.xlu1 %941 }
 0x7d1   :  { %2215 = vrcp.f32 %v942_v25 }
 0x7d4   :  { %v945_v44 = vpop.xlane.xlu0 %944  ;;  %v1126_v55 = vpop.permute.xlu1 %1125 }
 0x7d5   :  { %2217 = vrcp.f32 %v945_v44  ;;  %v1131_v60 = vsel %vm200_vm2, %v1126_v55, 0 }
 0x7d8   :  { %v948_v56 = vpop.xlane.xlu0 %947 }
 0x7d9   :  { %2219 = vrcp.f32 %v948_v56 }
 0x7db   :  { %v2216_v59 = vpop.eup %2215 }
 0x7dc   :  { %v951_v58 = vpop.xlane.xlu0 %950  ;;  %v956_v47 = vmul.f32 %v2216_v59, %v2208_v34 }
 0x7dd   :  { %2221 = vrcp.f32 %v951_v58 }
 0x7df   :  { %v2218_v46 = vpop.eup %2217 }
 0x7e0   :  { %v957_v51 = vmul.f32 %v2218_v46, %v2210_v37  ;;  %v1010_v52 = vpop.permute.xlu0 %1009 }
 0x7e1   :  { %2046 = vmatpush3.bf16.msra.mxu0 %v1010_v52 }
 0x7e2   :  { %v960_v23 = vpack.c.bf16 %v957_v51, %v956_v47  ;;  %2057 = vmatprep.subr.bf16.mxu0 %v2332_v16 }
 0x7e3   :  { %v2220_v28 = vpop.eup %2219 }
 0x7e4   :  { %2042 = vmatmul.mubr.msk.bf16.vlgmr.msra.gmra.mrb[20].mxu1 %vm200_vm2, %v960_v23  ;;  %v958_v53 = vmul.f32 %v2220_v28, %v2212_v39  ;;  %v1177_v61 = vpop.permute.xlu0 %1176 }
 0x7e5   :  { %2052 = vmatpush3.bf16.msra.mxu1 %v2161_v63  ;;  %v1182_v14 = vsel %vm200_vm2, %v1177_v61, 0 }
 0x7e6   :  { %2063 = vmatprep.subr.bf16.mxu1 %v2332_v16 }
 0x7e7   :  { %v2222_v30 = vpop.eup %2221 }
 0x7e8   :  { %v959_v54 = vmul.f32 %v2222_v30, %v2214_v41  ;;  %v1124_v62 = vpop.permute.xlu0 %1123 }
 0x7ea   :  { %v961_v57 = vpack.c.bf16 %v959_v54, %v958_v53 }
 0x7ec   :  { %2048 = vmatmul.mubr.msk.bf16.vlgmr.msra.gmra.mrb[32].mxu0 %vm200_vm2, %v961_v57  ;;  %v1175_v29 = vpop.permute.xlu0 %1174 }
 0x7ed   :  { %2058 = vmatpush3.bf16.xpose.msra.mxu0 %v1131_v60  ;;  %2059 = vmatprep.mubr.msk.bf16.mxu0 %vm2333_vm1, %v2332_v16 }
 0x7ee   :  { %2069 = vmatprep.subr.bf16.mxu0 %v2332_v16 }
 0x7f4   :  { %2060 = vmatmul.mubr.msk.bf16.vlgmr.msra.gmra.mrb[36].mxu0 %vm200_vm2, %v1124_v62 }
 0x7f5   :  { %2071 = vmatprep.mubr.msk.bf16.mxu0 %vm2333_vm1, %v2332_v16 }
 0x8b7   :  { %v1002_v0 = vpop.f32.mrb[20].mxu1 }
 0x8b8   :  { %v2043_v1 = vpop.f32.mrb[21].mxu1 }
 0x8b9   :  { %v1005_v2 = vpop.f32.mrb[22].mxu1 }
 0x8ba   :  { %v1056_v3 = vpack.c.bf16 %v1005_v2, %v1002_v0  ;;  %v2044_v4 = vpop.f32.mrb[23].mxu1 }
 0x8bb   :  { %v2162_v4 = vld [vmem:[#allocation2 + $0x18] sm:$0xff]  }
 0x8bc   :  { %2053 = vmatprep.mubr.msk.bf16.mxu1 %vm200_vm2, %v1056_v3 }
 0x8bf   :  { %v1049_v5 = vpop.f32.mrb[32].mxu0 }
 0x8c0   :  { %v2049_v6 = vpop.f32.mrb[33].mxu0 }
 0x8c1   :  { %v1052_v7 = vpop.f32.mrb[34].mxu0 }
 0x8c2   :  { %v1057_v8 = vpack.c.bf16 %v1052_v7, %v1049_v5  ;;  %v2050_v11 = vpop.f32.mrb[35].mxu0 }
 0x8c4   :  { %2054 = vmatmul.mubr.msk.bf16.vlgmr.msra.gmra.mrb[16].mxu1 %vm200_vm2, %v1057_v8 }
 0x8c5   :  { %2064 = vmatpush3.bf16.xpose.msra.mxu1 %v1182_v14  ;;  %2065 = vmatprep.mubr.msk.bf16.mxu1 %vm2333_vm1, %v2332_v16 }
 0x8c6   :  { %2075 = vmatprep.subr.bf16.mxu1 %v2332_v16 }
 0x8c7   :  { %v1167_v15 = vpop.f32.mrb[36].mxu0 }
 0x8c8   :  { %v1225_v17 = vmul.f32 0.25, %v1167_v15  ;;  %v2061_v18 = vpop.f32.mrb[37].mxu0 }
 0x8c9   :  { %v1170_v20 = vpop.f32.mrb[38].mxu0 }
 0x8ca   :  { %v1226_v22 = vmul.f32 0.25, %v1170_v20  ;;  %v2062_v24 = vpop.f32.mrb[39].mxu0  ;;  %v1229_v26 = vsel %vm200_vm2, %v1225_v17, -inf }
 0x8cb   :  { %1230 = vmax.xlane.f32.xlu0 %v1229_v26 }
 0x8cc   :  { %2066 = vmatmul.mubr.msk.bf16.vlgmr.msra.gmra.mrb[24].mxu1 %vm200_vm2, %v1175_v29  ;;  %v1232_v31 = vsel %vm200_vm2, %v1226_v22, -inf }
 0x8cd   :  { %1233 = vmax.xlane.f32.xlu1 %v1232_v31  ;;  %2077 = vmatprep.mubr.msk.bf16.mxu1 %vm2333_vm1, %v2332_v16 }
 0x958   :  { %v1231_v32 = vpop.xlane.xlu0 %1230 }
 0x959   :  { %v1241_v33 = vsub.f32 %v1225_v17, %v1231_v32 }
 0x95a   :  { %v1234_v37 = vpop.xlane.xlu1 %1233 }
 0x95b   :  { %v1245_v34 = vmul.f32 1.442695, %v1241_v33  ;;  %v1242_v38 = vsub.f32 %v1226_v22, %v1234_v37  ;;  %v1886_v22 = vld [vmem:[%s2779_s3] ss:$0 sm:$0xff]  ;;  %s2340_s3 = smov [#allocation7]  }
 0x95d   :  { %2223 = vpow2.f32 %v1245_v34  ;;  %v1247_v39 = vmul.f32 1.442695, %v1242_v38 }
 0x95f   :  { %2225 = vpow2.f32 %v1247_v39 }
 0x967   :  { %v2224_v35 = vpop.eup %2223 }
 0x968   :  { %v1253_v36 = vsel %vm200_vm2, %v2224_v35, 0.0 }
 0x969   :  { %1254 = vadd.xlane.f32.xlu1 %v1253_v36  ;;  %v2226_v50 = vpop.eup %2225 }
 0x96a   :  { %v1256_v19 = vsel %vm200_vm2, %v2226_v50, 0.0 }
 0x99f   :  { %v1218_v40 = vpop.f32.mrb[24].mxu1 }
 0x9a0   :  { %v1227_v41 = vmul.f32 0.25, %v1218_v40  ;;  %v2067_v42 = vpop.f32.mrb[25].mxu1 }
 0x9a1   :  { %v1221_v43 = vpop.f32.mrb[26].mxu1 }
 0x9a2   :  { %v1228_v45 = vmul.f32 0.25, %v1221_v43  ;;  %v2068_v48 = vpop.f32.mrb[27].mxu1  ;;  %v1235_v16 = vsel %vm200_vm2, %v1227_v41, -inf }
 0x9a3   :  { %1236 = vmax.xlane.f32.xlu0 %v1235_v16 }
 0x9a4   :  { %v1238_v49 = vsel %vm200_vm2, %v1228_v45, -inf }
 0x9a7   :  { %1239 = vmax.xlane.f32.xlu0 %v1238_v49 }
 0x9ab   :  { %1257 = vadd.xlane.f32.xlu0 %v1256_v19 }
 0x9f6   :  { %v1255_v30 = vpop.xlane.xlu1 %1254 }
 0xa30   :  { %v1237_v25 = vpop.xlane.xlu0 %1236 }
 0xa31   :  { %v1243_v44 = vsub.f32 %v1227_v41, %v1237_v25 }
 0xa33   :  { %v1249_v56 = vmul.f32 1.442695, %v1243_v44 }
 0xa34   :  { %v1240_v58 = vpop.xlane.xlu0 %1239 }
 0xa35   :  { %2227 = vpow2.f32 %v1249_v56  ;;  %v1244_v59 = vsub.f32 %v1228_v45, %v1240_v58 }
 0xa37   :  { %v1251_v46 = vmul.f32 1.442695, %v1244_v59 }
 0xa38   :  { %v1258_v28 = vpop.xlane.xlu0 %1257 }
 0xa39   :  { %2229 = vpow2.f32 %v1251_v46 }
 0xa3a   :  { %2231 = vrcp.f32 %v1258_v28  ;;  %v2163_v28 = vld [vmem:[#allocation5] sm:$0xff]  }
 0xa3b   :  { %2233 = vrcp.f32 %v1255_v30  ;;  %v2164_v30 = vld [vmem:[#allocation5 + $0x8] sm:$0xff]  }
 0xa3f   :  { %v2228_v47 = vpop.eup %2227 }
 0xa40   :  { %v1259_v51 = vsel %vm200_vm2, %v2228_v47, 0.0 }
 0xa41   :  { %1260 = vadd.xlane.f32.xlu1 %v1259_v51 }
 0xa43   :  { %v2230_v52 = vpop.eup %2229 }
 0xa44   :  { %v1262_v23 = vsel %vm200_vm2, %v2230_v52, 0.0  ;;  %v2232_v53 = vpop.eup %2231 }
 0xa45   :  { %1263 = vadd.xlane.f32.xlu0 %v1262_v23  ;;  %v2234_v55 = vpop.eup %2233  ;;  %v1270_v57 = vmul.f32 %v2232_v53, %v2226_v50  ;;  %v2165_v53 = vld [vmem:[#allocation5 + $0x10] sm:$0xff]  }
 0xa46   :  { %v1269_v60 = vmul.f32 %v2234_v55, %v2224_v35  ;;  %v2167_v55 = vld [vmem:[%s2782_s6] sm:$0xff]  }
 0xa48   :  { %v1273_v63 = vpack.c.bf16 %v1270_v57, %v1269_v60  ;;  %v2168_v57 = vld [vmem:[%s2782_s6 + $0x8] sm:$0xff]   ;;  %v2169_v60 = vld [vmem:[%s2782_s6 + $0x10] sm:$0xff]  }
 0xa52   :  { %1275 = vrot.lane.b32.xlu1 %v2490_v21, %s2339_s14 }
 0xa5b   :  { %1322 = vrot.lane.b32.xlu0 %v2498_v27, %s2339_s14 }
 0xace   :  { %v1261_v54 = vpop.xlane.xlu1 %1260 }
 0xacf   :  { %2235 = vrcp.f32 %v1261_v54  ;;  %v2166_v54 = vld [vmem:[#allocation5 + $0x18] sm:$0xff]  }
 0xad2   :  { %v1264_v61 = vpop.xlane.xlu0 %1263  ;;  %v1276_v62 = vpop.permute.xlu1 %1275 }
 0xad3   :  { %2237 = vrcp.f32 %v1264_v61  ;;  %2070 = vmatpush3.bf16.msra.mxu0 %v1276_v62  ;;  %v2170_v61 = vld [vmem:[%s2782_s6 + $0x18] sm:$0xff]   ;;  %v2171_v62 = vld [vmem:[%s2782_s6 + $0x20] sm:$0xff]  }
 0xad4   :  { %2087 = vmatprep.subr.bf16.mxu0 %v2163_v28 }
 0xad6   :  { %v1323_v0 = vpop.permute.xlu0 %1322  ;;  %2072 = vmatmul.mubr.msk.bf16.vlgmr.msra.gmra.mrb[40].mxu0 %vm200_vm2, %v1273_v63  ;;  %v2172_v63 = vld [vmem:[%s2782_s6 + $0x28] sm:$0xff]  }
 0xad7   :  { %2076 = vmatpush3.bf16.msra.mxu1 %v1323_v0  ;;  %2088 = vmatpush3.bf16.msra.mxu0 %v2163_v28 }
 0xad8   :  { %2081 = vmatprep.subr.bf16.mxu1 %v2162_v4  ;;  %2089 = vmatprep.subr.bf16.mxu0 %v2164_v30 }
 0xad9   :  { %v2236_v21 = vpop.eup %2235 }
 0xada   :  { %v1271_v1 = vmul.f32 %v2236_v21, %v2228_v47 }
 0xadb   :  { %2090 = vmatpush3.bf16.msra.mxu0 %v2164_v30 }
 0xadc   :  { %2091 = vmatprep.subr.bf16.mxu0 %v2165_v53 }
 0xadd   :  { %v2238_v27 = vpop.eup %2237 }
 0xade   :  { %v1272_v2 = vmul.f32 %v2238_v27, %v2230_v52 }
 0xadf   :  { %2092 = vmatpush3.bf16.msra.mxu0 %v2165_v53 }
 0xae0   :  { %v1274_v3 = vpack.c.bf16 %v1272_v2, %v1271_v1  ;;  %2093 = vmatprep.subr.bf16.mxu0 %v2166_v54 }
 0xae2   :  { %2078 = vmatmul.mubr.msk.bf16.vlgmr.msra.gmra.mrb[28].mxu1 %vm200_vm2, %v1274_v3 }
 0xae3   :  { %2082 = vmatpush3.bf16.msra.mxu1 %v2162_v4  ;;  %2094 = vmatpush3.bf16.msra.mxu0 %v2166_v54 }
 0xae4   :  { %2099 = vmatprep.subr.bf16.mxu1 %v2167_v55 }
 0xba9   :  { %v1315_v5 = vpop.f32.mrb[40].mxu0 }
 0xbaa   :  { %v2073_v6 = vpop.f32.mrb[41].mxu0 }
 0xbab   :  { %v1318_v7 = vpop.f32.mrb[42].mxu0 }
 0xbac   :  { %v1369_v8 = vpack.c.bf16 %v1318_v7, %v1315_v5  ;;  %v2074_v11 = vpop.f32.mrb[43].mxu0 }
 0xbae   :  { %2083 = vmatprep.mubr.msk.bf16.mxu1 %vm200_vm2, %v1369_v8 }
 0xbb5   :  { %v1362_v14 = vpop.f32.mrb[28].mxu1 }
 0xbb6   :  { %v2079_v15 = vpop.f32.mrb[29].mxu1 }
 0xbb7   :  { %v1365_v17 = vpop.f32.mrb[30].mxu1  ;;  %v1887_v15 = vld [vmem:[%s2784_s8] ss:$0 sm:$0xff] }
 0xbb8   :  { %v1370_v18 = vpack.c.bf16 %v1365_v17, %v1362_v14  ;;  %v2080_v20 = vpop.f32.mrb[31].mxu1 }
 0xbba   :  { %2084 = vmatmul.mubr.msk.bf16.vlgmr.msra.gmra.mrb[16].mxu1 %vm200_vm2, %v1370_v18 }
 0xbbb   :  { %2100 = vmatpush3.bf16.msra.mxu1 %v2167_v55 }
 0xbbc   :  { %2101 = vmatprep.subr.bf16.mxu1 %v2168_v57 }
 0xbbf   :  { %2102 = vmatpush3.bf16.msra.mxu1 %v2168_v57 }
 0xbc0   :  { %2103 = vmatprep.subr.bf16.mxu1 %v2169_v60 }
 0xbc3   :  { %2104 = vmatpush3.bf16.msra.mxu1 %v2169_v60 }
 0xbc4   :  { %2105 = vmatprep.subr.bf16.mxu1 %v2170_v61 }
 0xbc7   :  { %2106 = vmatpush3.bf16.msra.mxu1 %v2170_v61 }
 0xbc8   :  { %2107 = vmatprep.subr.bf16.mxu1 %v2171_v62 }
 0xbcb   :  { %2108 = vmatpush3.bf16.msra.mxu1 %v2171_v62 }
 0xbcc   :  { %2109 = vmatprep.subr.bf16.mxu1 %v2172_v63 }
 0xbcf   :  { %2110 = vmatpush3.bf16.msra.mxu1 %v2172_v63 }
 0xc8d   :  { %v2085_v24 = vpop.f32.mrb[16].mxu1 }
 0xc8e   :  { %v1417_v26 = vpop.f32.mrb[17].mxu1  ;;  %v1445_v29 = vadd.f32 %v2085_v24, %v1886_v22 }
 0xc8f   :  { %v1443_v31 = vadd.f32 %v1886_v22, %v1417_v26  ;;  %v2086_v32 = vpop.f32.mrb[18].mxu1  ;;  %v1888_v26 = vld [vmem:[%s2785_s9] ss:$0 sm:$0xff] }
 0xc90   :  { %v1420_v33 = vpop.f32.mrb[19].mxu1  ;;  %v1446_v34 = vadd.f32 %v2086_v32, %v1886_v22  ;;  %v1449_v39 = vadd.f32 %v1445_v29, %v2476_v12 }
 0xc91   :  { %v1444_v35 = vadd.f32 %v1886_v22, %v1420_v33  ;;  %v1447_v36 = vadd.f32 %v1443_v31, %v2463_v9 }
 0xc92   :  { %v1450_v41 = vadd.f32 %v1446_v34, %v2481_v13  ;;  %v1459_v42 = vsel %vm125_vm0, %v1449_v39, 0.0 }
 0xc93   :  { %v1453_v37 = vsel %vm125_vm0, %v1447_v36, 0.0  ;;  %v1448_v38 = vadd.f32 %v1444_v35, %v2468_v10 }
 0xc94   :  { %1454 = vadd.xlane.f32.xlu1 %v1453_v37  ;;  %v1462_v43 = vsel %vm125_vm0, %v1450_v41, 0.0 }
 0xc95   :  { %v1456_v40 = vsel %vm125_vm0, %v1448_v38, 0.0 }
 0xc96   :  { %1457 = vadd.xlane.f32.xlu0 %v1456_v40 }
 0xc98   :  { %1460 = vadd.xlane.f32.xlu1 %v1459_v42  ;;  %v2173_v42 = vld [vmem:[%s2782_s6 + $0x30] sm:$0xff]  }
 0xc99   :  { %2111 = vmatprep.subr.bf16.mxu1 %v2173_v42 }
 0xc9a   :  { %1463 = vadd.xlane.f32.xlu0 %v1462_v43  ;;  %2112 = vmatpush3.bf16.msra.mxu1 %v2173_v42  ;;  %v2174_v43 = vld [vmem:[%s2782_s6 + $0x38] sm:$0xff]  }
 0xc9b   :  { %2113 = vmatprep.subr.bf16.mxu1 %v2174_v43 }
 0xc9e   :  { %2114 = vmatpush3.bf16.msra.mxu1 %v2174_v43 }
 0xd21   :  { %v1455_v45 = vpop.xlane.xlu1 %1454 }
 0xd22   :  { %v1466_v9 = vmul.f32 0.015625, %v1455_v45  ;;  %v1889_v45 = vld [vmem:[%s2781_s5] ss:$0 sm:$0xff] }
 0xd23   :  { %v1458_v48 = vpop.xlane.xlu0 %1457 }
 0xd24   :  { %v2684_v16 = vsub.f32 %v1447_v36, %v1466_v9  ;;  %v1467_v10 = vmul.f32 0.015625, %v1458_v48 }
 0xd25   :  { %v1461_v49 = vpop.xlane.xlu1 %1460 }
 0xd26   :  { %v2686_v12 = vsub.f32 %v1448_v38, %v1467_v10  ;;  %v1468_v50 = vmul.f32 0.015625, %v1461_v49  ;;  %v1474_v13 = vmul.f32 %v2684_v16, %v2684_v16 }
 0xd27   :  { %v1464_v19 = vpop.xlane.xlu0 %1463 }
 0xd28   :  { %v2690_v25 = vsub.f32 %v1449_v39, %v1468_v50  ;;  %v1469_v44 = vmul.f32 0.015625, %v1464_v19  ;;  %v1478_v56 = vsel %vm125_vm0, %v1474_v13, 0.0  ;;  %v1475_v58 = vmul.f32 %v2686_v12, %v2686_v12 }
 0xd29   :  { %1479 = vadd.xlane.f32.xlu1 %v1478_v56 }
 0xd2a   :  { %v2695_v59 = vsub.f32 %v1450_v41, %v1469_v44  ;;  %v1481_v46 = vsel %vm125_vm0, %v1475_v58, 0.0  ;;  %v1476_v47 = vmul.f32 %v2690_v25, %v2690_v25 }
 0xd2b   :  { %1482 = vadd.xlane.f32.xlu0 %v1481_v46  ;;  %v1896_v46 = vld [vmem:[%s2783_s7] ss:$0 sm:$0xff] }
 0xd2c   :  { %v1484_v51 = vsel %vm125_vm0, %v1476_v47, 0.0  ;;  %v1477_v52 = vmul.f32 %v2695_v59, %v2695_v59 }
 0xd2d   :  { %1485 = vadd.xlane.f32.xlu1 %v1484_v51 }
 0xd2e   :  { %v1487_v23 = vsel %vm125_vm0, %v1477_v52, 0.0 }
 0xd2f   :  { %1488 = vadd.xlane.f32.xlu0 %v1487_v23 }
 0xdb6   :  { %v1480_v0 = vpop.xlane.xlu1 %1479 }
 0xdb7   :  { %v1490_v21 = vmul.f32 0.015625, %v1480_v0 }
 0xdb8   :  { %v1483_v27 = vpop.xlane.xlu0 %1482 }
 0xdb9   :  { %v1494_v1 = vadd.f32 1e-05, %v1490_v21  ;;  %v1491_v2 = vmul.f32 0.015625, %v1483_v27 }
 0xdba   :  { %v1486_v3 = vpop.xlane.xlu1 %1485 }
 0xdbb   :  { %2239 = vrsqrt.f32 %v1494_v1  ;;  %v1495_v4 = vadd.f32 1e-05, %v1491_v2  ;;  %v1492_v5 = vmul.f32 0.015625, %v1486_v3 }
 0xdbc   :  { %v1489_v6 = vpop.xlane.xlu0 %1488 }
 0xdbd   :  { %2241 = vrsqrt.f32 %v1495_v4  ;;  %v1496_v7 = vadd.f32 1e-05, %v1492_v5  ;;  %v1493_v8 = vmul.f32 0.015625, %v1489_v6 }
 0xdbf   :  { %2243 = vrsqrt.f32 %v1496_v7  ;;  %v1497_v11 = vadd.f32 1e-05, %v1493_v8 }
 0xdc1   :  { %2245 = vrsqrt.f32 %v1497_v11 }
 0xdc5   :  { %v2240_v14 = vpop.eup %2239 }
 0xdc6   :  { %v1502_v17 = vmul.f32 %v2240_v14, %v2684_v16 }
 0xdc7   :  { %v2242_v18 = vpop.eup %2241 }
 0xdc8   :  { %v1503_v20 = vmul.f32 %v2242_v18, %v2686_v12  ;;  %v1512_v22 = vmul.f32 %v1887_v15, %v1502_v17 }
 0xdc9   :  { %v2244_v24 = vpop.eup %2243 }
 0xdca   :  { %v1504_v29 = vmul.f32 %v2244_v24, %v2690_v25  ;;  %v1513_v31 = vmul.f32 %v1887_v15, %v1503_v20  ;;  %v1522_v35 = vadd.f32 %v1888_v26, %v1512_v22 }
 0xdcb   :  { %v2246_v32 = vpop.eup %2245 }
 0xdcc   :  { %v1514_v33 = vmul.f32 %v1887_v15, %v1504_v29  ;;  %v1505_v34 = vmul.f32 %v2246_v32, %v2695_v59  ;;  %v1523_v36 = vadd.f32 %v1888_v26, %v1513_v31 }
 0xdce   :  { %v1515_v37 = vmul.f32 %v1887_v15, %v1505_v34  ;;  %v1526_v38 = vpack.c.bf16 %v1523_v36, %v1522_v35  ;;  %v1524_v39 = vadd.f32 %v1888_v26, %v1514_v33 }
 0xdd0   :  { %2095 = vmatprep.mubr.msk.bf16.mxu0 %vm125_vm0, %v1526_v38  ;;  %v1525_v40 = vadd.f32 %v1888_v26, %v1515_v37 }
 0xdd2   :  { %v1527_v41 = vpack.c.bf16 %v1525_v40, %v1524_v39 }
 0xdd4   :  { %2096 = vmatmul.mubr.msk.bf16.vlgmr.msra.gmra.mrb[44].mxu0 %vm125_vm0, %v1527_v41 }
 0xea7   :  { %v2097_v9 = vpop.f32.mrb[44].mxu0 }
 0xea8   :  { %v1616_v48 = vadd.f32 %v2097_v9, %v1889_v45  ;;  %v1607_v16 = vpop.f32.mrb[45].mxu0  ;;  %v1905_v9 = vld [vmem:[%s2786_s10] ss:$0 sm:$0xff]  ;;  %s1835_s10 = sshll.u32 %s2340_s3, 4  ;;  %s1836_s10 = int_to_ptr.vmem [resolvable:$true] %s1835_s10 }
 0xea9   :  { %v1608_v10 = vadd.f32 %v1889_v45, %v1607_v16  ;;  %v2098_v49 = vpop.f32.mrb[46].mxu0  ;;  %p2304_p3 = scmp.lt.s32.totalorder %s1836_s10, %s1836_s10 }
 0xeaa   :  { %v1619_v12 = vadd.f32 %v2098_v49, %v1889_v45  ;;  %v1610_v50 = vpop.f32.mrb[47].mxu0  ;;  %v1624_v19 = vmax.f32 %v1616_v48, 0.0 }
 0xeab   :  { %v1611_v13 = vadd.f32 %v1889_v45, %v1610_v50  ;;  %v1622_v44 = vmax.f32 %v1608_v10, 0.0  ;;  %v1906_v10 = vld [vmem:[%s2787_s11] ss:$0 sm:$0xff]  ;;  %s2299_s11 = scalar_lea.vmem %s1836_s10, 512 }
 0xeac   :  { %v1625_v25 = vmax.f32 %v1619_v12, 0.0  ;;  %p2300_p2 = scmp.ne.s32.totalorder %s1836_s10, %s2299_s11  ;;  %p2305_p4 = scmp.lt.s32.totalorder %s2299_s11, %s2299_s11 }
 0xead   :  { %v1623_v56 = vmax.f32 %v1611_v13, 0.0 }
 0xeae   :  { %v1627_v58 = vpack.c.bf16 %v1625_v25, %v1624_v19  ;;  %p2306_p5 = por %p2305_p4, %p2304_p3 }
 0xeaf   :  { %v1626_v59 = vpack.c.bf16 %v1623_v56, %v1622_v44 }
 0xeb0   :  { %p2307_p6 = pnand %p2306_p5, %p2300_p2 }
 0xeb1   :  { %2115 = vmatprep.mubr.bf16.mxu1 %v1626_v59 }
 0xeb2   :  { %2116 = vmatmul.mubr.bf16.vlgmr.msra.gmra.mrb[32].mxu1 %v1627_v58 }
 0xf85   :  { %v2117_v47 = vpop.f32.mrb[32].mxu1 }
 0xf86   :  { %v1733_v51 = vpop.f32.mrb[33].mxu1  ;;  %v1742_v52 = vadd.f32 %v2117_v47, %v1896_v46 }
 0xf87   :  { %v1734_v23 = vadd.f32 %v1896_v46, %v1733_v51  ;;  %v2118_v28 = vpop.f32.mrb[34].mxu1 }
 0xf88   :  { %v1736_v30 = vpop.f32.mrb[35].mxu1  ;;  %v1745_v53 = vadd.f32 %v2118_v28, %v1896_v46  ;;  %v1750_v61 = vadd.f32 %v1742_v52, %v1524_v39 }
 0xf89   :  { %v1737_v54 = vadd.f32 %v1896_v46, %v1736_v30  ;;  %v1748_v55 = vadd.f32 %v1734_v23, %v1522_v35 }
 0xf8a   :  { %v1751_v63 = vadd.f32 %v1745_v53, %v1525_v40  ;;  %v1760_v0 = vsel %vm125_vm0, %v1750_v61, 0.0 }
 0xf8b   :  { %v1754_v57 = vsel %vm125_vm0, %v1748_v55, 0.0  ;;  %v1749_v60 = vadd.f32 %v1737_v54, %v1523_v36 }
 0xf8c   :  { %1755 = vadd.xlane.f32.xlu1 %v1754_v57  ;;  %v1763_v21 = vsel %vm125_vm0, %v1751_v63, 0.0 }
 0xf8d   :  { %v1757_v62 = vsel %vm125_vm0, %v1749_v60, 0.0 }
 0xf8e   :  { %1758 = vadd.xlane.f32.xlu0 %v1757_v62 }
 0xf90   :  { %1761 = vadd.xlane.f32.xlu1 %v1760_v0 }
 0xf92   :  { %1764 = vadd.xlane.f32.xlu0 %v1763_v21 }
0x1019   :  { %v1756_v27 = vpop.xlane.xlu1 %1755 }
0x101a   :  { %v1766_v1 = vmul.f32 0.015625, %v1756_v27 }
0x101b   :  { %v1759_v2 = vpop.xlane.xlu0 %1758 }
0x101c   :  { %v1770_v3 = vsub.f32 %v1748_v55, %v1766_v1  ;;  %v1767_v4 = vmul.f32 0.015625, %v1759_v2 }
0x101d   :  { %v1762_v5 = vpop.xlane.xlu1 %1761 }
0x101e   :  { %v1771_v6 = vsub.f32 %v1749_v60, %v1767_v4  ;;  %v1768_v7 = vmul.f32 0.015625, %v1762_v5  ;;  %v1774_v8 = vmul.f32 %v1770_v3, %v1770_v3 }
0x101f   :  { %v1765_v11 = vpop.xlane.xlu0 %1764 }
0x1020   :  { %v1772_v14 = vsub.f32 %v1750_v61, %v1768_v7  ;;  %v1769_v15 = vmul.f32 0.015625, %v1765_v11  ;;  %v1778_v17 = vsel %vm125_vm0, %v1774_v8, 0.0  ;;  %v1775_v18 = vmul.f32 %v1771_v6, %v1771_v6 }
0x1021   :  { %1779 = vadd.xlane.f32.xlu1 %v1778_v17 }
0x1022   :  { %v1773_v20 = vsub.f32 %v1751_v63, %v1769_v15  ;;  %v1781_v22 = vsel %vm125_vm0, %v1775_v18, 0.0  ;;  %v1776_v24 = vmul.f32 %v1772_v14, %v1772_v14 }
0x1023   :  { %1782 = vadd.xlane.f32.xlu0 %v1781_v22 }
0x1024   :  { %v1784_v26 = vsel %vm125_vm0, %v1776_v24, 0.0  ;;  %v1777_v29 = vmul.f32 %v1773_v20, %v1773_v20 }
0x1025   :  { %1785 = vadd.xlane.f32.xlu1 %v1784_v26 }
0x1026   :  { %v1787_v31 = vsel %vm125_vm0, %v1777_v29, 0.0 }
0x1027   :  { %1788 = vadd.xlane.f32.xlu0 %v1787_v31 }
0x10ae   :  { %v1780_v32 = vpop.xlane.xlu1 %1779 }
0x10af   :  { %v1790_v33 = vmul.f32 0.015625, %v1780_v32 }
0x10b0   :  { %v1783_v34 = vpop.xlane.xlu0 %1782 }
0x10b1   :  { %v1794_v35 = vadd.f32 1e-05, %v1790_v33  ;;  %v1791_v36 = vmul.f32 0.015625, %v1783_v34 }
0x10b2   :  { %v1786_v37 = vpop.xlane.xlu1 %1785 }
0x10b3   :  { %2247 = vrsqrt.f32 %v1794_v35  ;;  %v1795_v38 = vadd.f32 1e-05, %v1791_v36  ;;  %v1792_v39 = vmul.f32 0.015625, %v1786_v37 }
0x10b4   :  { %v1789_v40 = vpop.xlane.xlu0 %1788 }
0x10b5   :  { %2249 = vrsqrt.f32 %v1795_v38  ;;  %v1796_v41 = vadd.f32 1e-05, %v1792_v39  ;;  %v1793_v42 = vmul.f32 0.015625, %v1789_v40 }
0x10b7   :  { %2251 = vrsqrt.f32 %v1796_v41  ;;  %v1797_v43 = vadd.f32 1e-05, %v1793_v42 }
0x10b9   :  { %2253 = vrsqrt.f32 %v1797_v43 }
0x10bd   :  { %v2248_v45 = vpop.eup %2247 }
0x10be   :  { %v1802_v48 = vmul.f32 %v2248_v45, %v1770_v3 }
0x10bf   :  { %v2250_v16 = vpop.eup %2249 }
0x10c0   :  { %v1812_v49 = vmul.f32 %v1905_v9, %v1802_v48  ;;  %v1803_v12 = vmul.f32 %v2250_v16, %v1771_v6 }
0x10c1   :  { %v2252_v50 = vpop.eup %2251 }
0x10c2   :  { %v1822_v13 = vadd.f32 %v1906_v10, %v1812_v49  ;;  %v1813_v19 = vmul.f32 %v1905_v9, %v1803_v12  ;;  %v1804_v25 = vmul.f32 %v2252_v50, %v1772_v14 }
0x10c3   :  { %v2254_v44 = vpop.eup %2253 }
0x10c4   :  { %1826 = vst.msk [vmem:[#allocation7] sm:$0xff] %vm125_vm0, %v1822_v13  ;;  %v1823_v56 = vadd.f32 %v1906_v10, %v1813_v19  ;;  %v1814_v58 = vmul.f32 %v1905_v9, %v1804_v25  ;;  %v1805_v59 = vmul.f32 %v2254_v44, %v1773_v20 }
0x10c6   :  { %1827 = vst.msk [vmem:[#allocation7 + $0x8] sm:$0xff] %vm125_vm0, %v1823_v56  ;;  %v1824_v46 = vadd.f32 %v1906_v10, %v1814_v58  ;;  %v1815_v47 = vmul.f32 %v1905_v9, %v1805_v59 }
0x10c8   :  { %1828 = vst.msk [vmem:[#allocation7 + $0x10] sm:$0xff] %vm125_vm0, %v1824_v46  ;;  %v1825_v51 = vadd.f32 %v1906_v10, %v1815_v47 }
0x10ca   :  { %1829 = vst.msk [vmem:[#allocation7 + $0x18] sm:$0xff] %vm125_vm0, %v1825_v51 }
0x10cb   :  { %2310 = shalt.err (!%p2307_p6)
}
0x10cc   :  { %s2311_s23 = scalar_lea.hbm %s2788_s12, 512 }
0x10cd   :  { %p2312_p7 = scmp.ne.s32.totalorder %s2788_s12, %s2311_s23  ;;  %p2315_p8 = scmp.lt.u32.totalorder %s2311_s23, %s2788_s12 }
0x10cf   :  { %p2317_p9 = pnand %p2315_p8, %p2312_p7 }
0x10d1   :  { %2320 = shalt.err (!%p2317_p9)
}
0x10d2   :  { %s2341_s2 = smov 128   ;;  %s2342_s22 = smov 8  }
0x10d3   :  { %1841 = dma.vmem_to_hbm [thread:$0]  %s1836_s10, 512, %s2788_s12, [#allocation4], %s2341_s2, %s2341_s2, %s2342_s22  }
0x10d4   :  { %2325 = dma.done.wait [#allocation4], 512  }
0x10d5   :  { %2326 = vsyncadd [#allocation4], 4294966784 }
0x10d6   :  { %1845 = vsyncpa [#allocation3], 1 }
0x10d7   :  { %1846 = vsyncpa [#allocation6], 1 }
0x10d8   :  { %1847 = vsyncpa [#allocation4], 1 }

</bundles_post_ra>
